<compile_context>
chip_gen: v6e
topology: v6e:2x2x1
jax: 0.10.0
libtpu: 0.0.40
codegen_flags: <defaults>
</compile_context>

<pallas_src>
import functools

import jax
import jax.numpy as jnp
from jax.experimental import pallas as pl
from jax.experimental.pallas import tpu as pltpu

EPS_LN = 1e-6   # partial(nn.LayerNorm, eps=1e-6) used in every Block / final norm
EPS_BN = 1e-5   # nn.BatchNorm2d default eps


# ----------------------------- in-kernel helpers -----------------------------

def _erf(x):
    # f32-accurate erf (Abramowitz & Stegun 7.1.26, |abs err| < 1.5e-7) built
    # only from ops with guaranteed Pallas TPU lowerings (exp/abs/where/mul).
    a1, a2, a3, a4, a5 = (0.254829592, -0.284496736, 1.421413741,
                          -1.453152027, 1.061405429)
    p = 0.3275911
    sgn = jnp.where(x < 0.0, -1.0, 1.0)
    ax = jnp.abs(x)
    t = 1.0 / (1.0 + p * ax)
    poly = ((((a5 * t + a4) * t + a3) * t + a2) * t + a1) * t
    return sgn * (1.0 - poly * jnp.exp(-ax * ax))


def _gelu_exact(x):
    # nn.GELU default (erf-based, not the tanh approximation)
    return 0.5 * x * (1.0 + _erf(x * (2.0 ** -0.5)))


def _layernorm(x, g, b, eps=EPS_LN):
    mu = jnp.mean(x, axis=-1, keepdims=True)
    var = jnp.mean(jnp.square(x - mu), axis=-1, keepdims=True)
    return (x - mu) * jax.lax.rsqrt(var + eps) * g + b


# --------------------------------- fused kernel -------------------------------

def fused_transformer_kernel(patches_ref, wp_ref, posb_ref,
                             ln1g_ref, ln1b_ref,
                             wq_ref, bq_ref, wk_ref, bk_ref, wv_ref, bv_ref,
                             wo_ref, bo_ref,
                             ln2g_ref, ln2b_ref,
                             w1_ref, b1_ref, w2_ref, b2_ref,
                             ng_ref, nb_ref,
                             out_ref, *, num_heads):
    f32, bf16 = jnp.float32, jnp.bfloat16
    d = pl.program_id(1)
    last = pl.num_programs(1) - 1

    # depth step 0: patch embedding (Conv2d with stride == kernel recast as a
    # token-major matmul) + conv bias + positional embedding (pre-summed).
    @pl.when(d == 0)
    def _():
        p = patches_ref[...].astype(bf16)
        y = jnp.dot(p, wp_ref[...], preferred_element_type=f32)
        out_ref[...] = y + posb_ref[...]

    # residual stream, f32, VMEM-resident across the whole depth axis
    x = out_ref[...]
    H = num_heads
    N, C = x.shape
    D = C // H
    scale = float(D) ** -0.5

    # ---- pre-LN multi-head self-attention ----
    xn = _layernorm(x, ln1g_ref[...], ln1b_ref[...])
    xnb = xn.astype(bf16)
    ctx = []
    for h in range(H):                       # static unroll over heads
        qh = jnp.dot(xnb, wq_ref[h], preferred_element_type=f32) + bq_ref[h]
        kh = jnp.dot(xnb, wk_ref[h], preferred_element_type=f32) + bk_ref[h]
        vh = jnp.dot(xnb, wv_ref[h], preferred_element_type=f32) + bv_ref[h]
        # scores = qh @ kh^T (contract the head dim of both operands)
        s = jax.lax.dot_general(qh.astype(bf16), kh.astype(bf16),
                                (((1,), (1,)), ((), ())),
                                preferred_element_type=f32) * scale
        s = s - jnp.max(s, axis=-1, keepdims=True)
        e = jnp.exp(s)
        pr = e * pl.reciprocal(jnp.sum(e, axis=-1, keepdims=True), approx=True)
        ctx.append(jnp.dot(pr.astype(bf16), vh.astype(bf16),
                           preferred_element_type=f32))
    ctx = jnp.concatenate(ctx, axis=-1)      # (N, C), head-major column blocks
    attn = jnp.dot(ctx.astype(bf16), wo_ref[...],
                   preferred_element_type=f32) + bo_ref[...]
    x = x + attn

    # ---- pre-LN MLP ----
    xn2 = _layernorm(x, ln2g_ref[...], ln2b_ref[...])
    h1 = jnp.dot(xn2.astype(bf16), w1_ref[...],
                 preferred_element_type=f32) + b1_ref[...]
    h1 = _gelu_exact(h1)
    h2 = jnp.dot(h1.astype(bf16), w2_ref[...],
                 preferred_element_type=f32) + b2_ref[...]
    x = x + h2

    out_ref[...] = x

    # final LayerNorm (self.norm) folded into the last depth step
    @pl.when(d == last)
    def _():
        out_ref[...] = _layernorm(x, ng_ref[...], nb_ref[...])


# ------------------------------- BlockSpec glue -------------------------------

def _fullspec(arr):
    # whole array, broadcast across the (batch, depth) grid
    nd = arr.ndim
    return pl.BlockSpec(arr.shape, lambda b, d, _n=nd: (0,) * _n)


def _depthspec(arr):
    # (depth, ...) array -> per-depth-step slice, depth dim squeezed
    rest = arr.shape[1:]
    nz = len(rest)
    return pl.BlockSpec((None,) + rest, lambda b, d, _n=nz: (d,) + (0,) * _n)


def _batchspec(arr):
    # (B, ...) array -> per-batch-step slice, batch dim squeezed
    rest = arr.shape[1:]
    nz = len(rest)
    return pl.BlockSpec((None,) + rest, lambda b, d, _n=nz: (b,) + (0,) * _n)


# ------------------------------ model wrapper ---------------------------------

def audio_transformer_forward(aud, params, cfg):
    B, T_len, n_mels = aud.shape
    ps, C, H = cfg["patch_size"], cfg["embed_dim"], cfg["num_heads"]
    depth = cfg["depth"]
    D = C // H
    Fp, Tp = n_mels // ps, T_len // ps
    N, P = Fp * Tp, ps * ps
    bf16 = jnp.bfloat16

    # ---- glue: eval-mode BatchNorm over mel bins + patch extraction ----
    # TODO(synk): training-mode BatchNorm (batch statistics) not implemented;
    # inference-mode running statistics are used (matches module.eval()).
    x = jnp.transpose(aud, (0, 2, 1))                       # (B, n_mels, T)
    bn = params["bn"]
    inv = bn["gamma"] / jnp.sqrt(bn["var"] + EPS_BN)
    x = x * inv[None, :, None] + (bn["beta"] - bn["mean"] * inv)[None, :, None]
    patches = (x.reshape(B, Fp, ps, Tp, ps)
                .transpose(0, 1, 3, 2, 4)
                .reshape(B, N, P))

    # conv bias + positional embedding folded into a single (N, C) operand;
    # token order n = f * Tp + t (matches rearrange 'b c f t -> b (f t) c')
    pos = (params["time_pos"][0, :, 0, :][:, None, :]
           + params["freq_pos"][0, :, :, 0][:, :, None])    # (C, Fp, Tp)
    posb = pos.transpose(1, 2, 0).reshape(N, C) + params["patch_b"][None, :]
    w_patch = params["patch_w"].reshape(C, P).T.astype(bf16)  # (P, C)

    # ---- stack per-block weights along a leading depth axis ----
    blocks = params["blocks"]

    def stack(fn):
        return jnp.stack([fn(blk) for blk in blocks])

    def split_w(w):   # (C, C) [in, out] -> (H, C, D)
        return w.reshape(C, H, D).transpose(1, 0, 2)

    def split_b(b):   # (1, C) -> (H, 1, D)
        return b.reshape(H, D)[:, None, :]

    ln1g = stack(lambda p_: p_["ln1_g"]); ln1b = stack(lambda p_: p_["ln1_b"])
    wq = stack(lambda p_: split_w(p_["wq"]).astype(bf16))
    bq = stack(lambda p_: split_b(p_["bq"]))
    wk = stack(lambda p_: split_w(p_["wk"]).astype(bf16))
    bk = stack(lambda p_: split_b(p_["bk"]))
    wv = stack(lambda p_: split_w(p_["wv"]).astype(bf16))
    bv = stack(lambda p_: split_b(p_["bv"]))
    wo = stack(lambda p_: p_["wo"].astype(bf16)); bo = stack(lambda p_: p_["bo"])
    ln2g = stack(lambda p_: p_["ln2_g"]); ln2b = stack(lambda p_: p_["ln2_b"])
    w1 = stack(lambda p_: p_["w1"].astype(bf16)); b1 = stack(lambda p_: p_["b1"])
    w2 = stack(lambda p_: p_["w2"].astype(bf16)); b2 = stack(lambda p_: p_["b2"])

    depth_args = (ln1g, ln1b, wq, bq, wk, bk, wv, bv, wo, bo,
                  ln2g, ln2b, w1, b1, w2, b2)
    full_args = (params["norm_g"], params["norm_b"])

    in_specs = ([_batchspec(patches), _fullspec(w_patch), _fullspec(posb)]
                + [_depthspec(a) for a in depth_args]
                + [_fullspec(a) for a in full_args])

    out = pl.pallas_call(
        functools.partial(fused_transformer_kernel, num_heads=H),
        out_shape=jax.ShapeDtypeStruct((B, N, C), jnp.float32),
        grid=(B, depth),
        in_specs=in_specs,
        # output block index ignores d -> the token tile stays VMEM-resident
        # (accumulator / residual-stream carrier) across the depth axis
        out_specs=pl.BlockSpec((None, N, C), lambda b, d: (b, 0, 0)),
        compiler_params=pltpu.CompilerParams(
            dimension_semantics=("parallel", "arbitrary"),
            vmem_limit_bytes=64 * 1024 * 1024),
    )(patches, w_patch, posb, *depth_args, *full_args)
    return out


# -------------------------- deterministic parameters --------------------------

def init_params(key, *, n_mels, target_length, patch_size, embed_dim, depth,
                num_heads, mlp_ratio):
    C = embed_dim
    Ch = int(C * mlp_ratio)
    Fp = n_mels // patch_size
    Tp = target_length // patch_size
    ks = iter(jax.random.split(key, 64))

    def nrm(shape, std=0.02):
        return jax.random.normal(next(ks), shape, jnp.float32) * std

    params = {}
    params["bn"] = dict(gamma=1.0 + nrm((n_mels,)), beta=nrm((n_mels,)),
                        mean=nrm((n_mels,)), var=1.0 + jnp.abs(nrm((n_mels,))))
    params["patch_w"] = nrm((C, 1, patch_size, patch_size))   # Conv2d weight
    params["patch_b"] = nrm((C,))                             # Conv2d bias
    params["time_pos"] = nrm((1, C, 1, Tp))
    params["freq_pos"] = nrm((1, C, Fp, 1))
    blocks = []
    for _ in range(depth):
        blocks.append(dict(
            ln1_g=1.0 + nrm((1, C)), ln1_b=nrm((1, C)),
            wq=nrm((C, C)), bq=nrm((1, C)),
            wk=nrm((C, C)), bk=nrm((1, C)),
            wv=nrm((C, C)), bv=nrm((1, C)),
            wo=nrm((C, C)), bo=nrm((1, C)),
            ln2_g=1.0 + nrm((1, C)), ln2_b=nrm((1, C)),
            w1=nrm((C, Ch)), b1=nrm((1, Ch)),
            w2=nrm((Ch, C)), b2=nrm((1, C)),
        ))
    params["blocks"] = blocks
    params["norm_g"] = 1.0 + nrm((1, C))
    params["norm_b"] = nrm((1, C))
    return params


# ----------------------------- pure-JAX reference ------------------------------

def reference_forward(aud, params, cfg):
    ps, C, H = cfg["patch_size"], cfg["embed_dim"], cfg["num_heads"]
    B, T_len, n_mels = aud.shape
    Fp, Tp = n_mels // ps, T_len // ps
    N, P = Fp * Tp, ps * ps
    D = C // H

    x = jnp.transpose(aud, (0, 2, 1))
    bn = params["bn"]
    inv = bn["gamma"] / jnp.sqrt(bn["var"] + EPS_BN)
    x = x * inv[None, :, None] + (bn["beta"] - bn["mean"] * inv)[None, :, None]
    patches = x.reshape(B, Fp, ps, Tp, ps).transpose(0, 1, 3, 2, 4).reshape(B, N, P)
    tok = patches @ params["patch_w"].reshape(C, P).T + params["patch_b"][None, None, :]
    pos = (params["time_pos"][0, :, 0, :][:, None, :]
           + params["freq_pos"][0, :, :, 0][:, :, None])
    tok = tok + pos.transpose(1, 2, 0).reshape(1, N, C)

    def ln(y, g, b):
        mu = y.mean(-1, keepdims=True)
        var = ((y - mu) ** 2).mean(-1, keepdims=True)
        return (y - mu) / jnp.sqrt(var + EPS_LN) * g + b

    for blk in params["blocks"]:
        xn = ln(tok, blk["ln1_g"], blk["ln1_b"])
        q = (xn @ blk["wq"] + blk["bq"]).reshape(B, N, H, D).transpose(0, 2, 1, 3)
        k = (xn @ blk["wk"] + blk["bk"]).reshape(B, N, H, D).transpose(0, 2, 1, 3)
        v = (xn @ blk["wv"] + blk["bv"]).reshape(B, N, H, D).transpose(0, 2, 1, 3)
        s = (q @ jnp.swapaxes(k, -2, -1)) * (float(D) ** -0.5)
        p = jax.nn.softmax(s, axis=-1)
        o = (p @ v).transpose(0, 2, 1, 3).reshape(B, N, C)
        tok = tok + (o @ blk["wo"] + blk["bo"])
        xn2 = ln(tok, blk["ln2_g"], blk["ln2_b"])
        h1 = _gelu_exact(xn2 @ blk["w1"] + blk["b1"])
        tok = tok + (h1 @ blk["w2"] + blk["b2"])
    return ln(tok, params["norm_g"], params["norm_b"])


# ------------------------------------ main -------------------------------------

if __name__ == "__main__":
    # lane-dense small config: C = 128 (one lane tile), N = 8 tokens (one sublane tile)
    cfg = dict(n_mels=16, target_length=32, patch_size=8, embed_dim=128,
               depth=2, num_heads=4, mlp_ratio=4.0)
    B = 2
    key = jax.random.PRNGKey(0)
    k_in, k_par = jax.random.split(key)
    aud = jax.random.normal(k_in, (B, cfg["target_length"], cfg["n_mels"]),
                            jnp.float32)
    params = init_params(k_par, **cfg)

    out = jax.block_until_ready(audio_transformer_forward(aud, params, cfg))

    N = (cfg["n_mels"] // cfg["patch_size"]) * (cfg["target_length"] // cfg["patch_size"])
    assert out.shape == (B, N, cfg["embed_dim"]), out.shape
    assert bool(jnp.isfinite(out).all())

    with jax.default_matmul_precision("float32"):
        ref = jax.block_until_ready(reference_forward(aud, params, cfg))
    max_err = float(jnp.max(jnp.abs(out - ref)))
    # kernel runs bf16 matmuls with f32 accumulation; reference is full f32
    assert max_err < 5e-2, f"max abs err vs reference = {max_err}"
    print("KERNEL_OK")
</pallas_src>

<mosaic_0001>
module attributes {stable_mosaic.version = 11 : i64} {
  func.func @fused_transformer_kernel(%arg0: i32, %arg1: i32, %arg2: memref<1x8x64xf32, #tpu.memory_space<vmem>>, %arg3: memref<64x128xbf16, #tpu.memory_space<vmem>>, %arg4: memref<8x128xf32, #tpu.memory_space<vmem>>, %arg5: memref<1x1x128xf32, #tpu.memory_space<vmem>>, %arg6: memref<1x1x128xf32, #tpu.memory_space<vmem>>, %arg7: memref<1x4x128x32xbf16, #tpu.memory_space<vmem>>, %arg8: memref<1x4x1x32xf32, #tpu.memory_space<vmem>>, %arg9: memref<1x4x128x32xbf16, #tpu.memory_space<vmem>>, %arg10: memref<1x4x1x32xf32, #tpu.memory_space<vmem>>, %arg11: memref<1x4x128x32xbf16, #tpu.memory_space<vmem>>, %arg12: memref<1x4x1x32xf32, #tpu.memory_space<vmem>>, %arg13: memref<1x128x128xbf16, #tpu.memory_space<vmem>>, %arg14: memref<1x1x128xf32, #tpu.memory_space<vmem>>, %arg15: memref<1x1x128xf32, #tpu.memory_space<vmem>>, %arg16: memref<1x1x128xf32, #tpu.memory_space<vmem>>, %arg17: memref<1x128x512xbf16, #tpu.memory_space<vmem>>, %arg18: memref<1x1x512xf32, #tpu.memory_space<vmem>>, %arg19: memref<1x512x128xbf16, #tpu.memory_space<vmem>>, %arg20: memref<1x1x128xf32, #tpu.memory_space<vmem>>, %arg21: memref<1x128xf32, #tpu.memory_space<vmem>>, %arg22: memref<1x128xf32, #tpu.memory_space<vmem>>, %arg23: memref<1x8x128xf32, #tpu.memory_space<vmem>>) attributes {dimension_semantics = [#tpu.dimension_semantics<parallel>, #tpu.dimension_semantics<arbitrary>], iteration_bounds = array<i64: 2, 2>, scalar_prefetch = 0 : i64, scratch_operands = 0 : i64, tpu.core_type = #tpu.core_type<tc>, window_params = [{transform_indices = @transform_0, window_bounds = array<i64: 1, 8, 64>}, {pipeline_mode = #tpu.pipeline_mode<synchronous>, transform_indices = @transform_1, window_bounds = array<i64: 64, 128>}, {pipeline_mode = #tpu.pipeline_mode<synchronous>, transform_indices = @transform_2, window_bounds = array<i64: 8, 128>}, {transform_indices = @transform_3, window_bounds = array<i64: 1, 1, 128>}, {transform_indices = @transform_4, window_bounds = array<i64: 1, 1, 128>}, {transform_indices = @transform_5, window_bounds = array<i64: 1, 4, 128, 32>}, {transform_indices = @transform_6, window_bounds = array<i64: 1, 4, 1, 32>}, {transform_indices = @transform_7, window_bounds = array<i64: 1, 4, 128, 32>}, {transform_indices = @transform_8, window_bounds = array<i64: 1, 4, 1, 32>}, {transform_indices = @transform_9, window_bounds = array<i64: 1, 4, 128, 32>}, {transform_indices = @transform_10, window_bounds = array<i64: 1, 4, 1, 32>}, {transform_indices = @transform_11, window_bounds = array<i64: 1, 128, 128>}, {transform_indices = @transform_12, window_bounds = array<i64: 1, 1, 128>}, {transform_indices = @transform_13, window_bounds = array<i64: 1, 1, 128>}, {transform_indices = @transform_14, window_bounds = array<i64: 1, 1, 128>}, {transform_indices = @transform_15, window_bounds = array<i64: 1, 128, 512>}, {transform_indices = @transform_16, window_bounds = array<i64: 1, 1, 512>}, {transform_indices = @transform_17, window_bounds = array<i64: 1, 512, 128>}, {transform_indices = @transform_18, window_bounds = array<i64: 1, 1, 128>}, {pipeline_mode = #tpu.pipeline_mode<synchronous>, transform_indices = @transform_19, window_bounds = array<i64: 1, 128>}, {pipeline_mode = #tpu.pipeline_mode<synchronous>, transform_indices = @transform_20, window_bounds = array<i64: 1, 128>}, {transform_indices = @transform_21, window_bounds = array<i64: 1, 8, 128>}]} {
    %c0_i32 = arith.constant 0 : i32
    %0 = arith.cmpi eq, %arg1, %c0_i32 : i32
    %1 = arith.extui %0 : i1 to i32
    %c0_i32_0 = arith.constant 0 : i32
    %2 = arith.cmpi ne, %1, %c0_i32_0 : i32
    scf.if %2 {
      %c0_190 = arith.constant 0 : index
      %c0_191 = arith.constant 0 : index
      %c0_192 = arith.constant 0 : index
      %288 = vector.load %arg2[%c0_190, %c0_191, %c0_192] : memref<1x8x64xf32, #tpu.memory_space<vmem>>, vector<1x8x64xf32>
      %289 = vector.shape_cast %288 : vector<1x8x64xf32> to vector<8x64xf32>
      %290 = arith.truncf %289 : vector<8x64xf32> to vector<8x64xbf16>
      %c0_193 = arith.constant 0 : index
      %c0_194 = arith.constant 0 : index
      %291 = vector.load %arg3[%c0_193, %c0_194] : memref<64x128xbf16, #tpu.memory_space<vmem>>, vector<64x128xbf16>
      %cst_195 = arith.constant dense<0.000000e+00> : vector<8x128xf32>
      %292 = tpu.matmul %290, %291, %cst_195 {dimension_numbers = #tpu.dot_dimension_numbers<[1], [0], [0], [1], [0, 0, 1, 1], [], []>} : vector<8x64xbf16>, vector<64x128xbf16>, vector<8x128xf32> -> vector<8x128xf32>
      %c0_196 = arith.constant 0 : index
      %c0_197 = arith.constant 0 : index
      %293 = vector.load %arg4[%c0_196, %c0_197] : memref<8x128xf32, #tpu.memory_space<vmem>>, vector<8x128xf32>
      %294 = arith.addf %292, %293 : vector<8x128xf32>
      %c0_198 = arith.constant 0 : index
      %c0_199 = arith.constant 0 : index
      %c0_200 = arith.constant 0 : index
      %295 = vector.load %arg23[%c0_198, %c0_199, %c0_200] : memref<1x8x128xf32, #tpu.memory_space<vmem>>, vector<1x8x128xf32>
      %296 = vector.shape_cast %295 : vector<1x8x128xf32> to vector<8x128xf32>
      %297 = vector.shape_cast %294 : vector<8x128xf32> to vector<1x8x128xf32>
      tpu.vector_store %arg23[%c0_198, %c0_199, %c0_200], %297 {strides = array<i32>} : memref<1x8x128xf32, #tpu.memory_space<vmem>>, vector<1x8x128xf32>,
    } else {
    }
    %c0 = arith.constant 0 : index
    %c0_1 = arith.constant 0 : index
    %c0_2 = arith.constant 0 : index
    %3 = vector.load %arg23[%c0, %c0_1, %c0_2] : memref<1x8x128xf32, #tpu.memory_space<vmem>>, vector<1x8x128xf32>
    %4 = vector.shape_cast %3 : vector<1x8x128xf32> to vector<8x128xf32>
    %c0_3 = arith.constant 0 : index
    %c0_4 = arith.constant 0 : index
    %c0_5 = arith.constant 0 : index
    %5 = vector.load %arg5[%c0_3, %c0_4, %c0_5] : memref<1x1x128xf32, #tpu.memory_space<vmem>>, vector<1x1x128xf32>
    %6 = vector.shape_cast %5 : vector<1x1x128xf32> to vector<1x128xf32>
    %c0_6 = arith.constant 0 : index
    %c0_7 = arith.constant 0 : index
    %c0_8 = arith.constant 0 : index
    %7 = vector.load %arg6[%c0_6, %c0_7, %c0_8] : memref<1x1x128xf32, #tpu.memory_space<vmem>>, vector<1x1x128xf32>
    %8 = vector.shape_cast %7 : vector<1x1x128xf32> to vector<1x128xf32>
    %cst = arith.constant dense<0.000000e+00> : vector<8xf32>
    %9 = vector.multi_reduction <add>, %4, %cst [1] : vector<8x128xf32> to vector<8xf32>
    %10 = vector.shape_cast %9 : vector<8xf32> to vector<8x1xf32>
    %cst_9 = arith.constant 1.280000e+02 : f32
    %11 = vector.broadcast %cst_9 : f32 to vector<8x1xf32>
    %12 = arith.divf %10, %11 : vector<8x1xf32>
    %13 = vector.broadcast %12 : vector<8x1xf32> to vector<8x128xf32>
    %14 = arith.subf %4, %13 : vector<8x128xf32>
    %15 = arith.mulf %14, %14 : vector<8x128xf32>
    %cst_10 = arith.constant dense<0.000000e+00> : vector<8xf32>
    %16 = vector.multi_reduction <add>, %15, %cst_10 [1] : vector<8x128xf32> to vector<8xf32>
    %17 = vector.shape_cast %16 : vector<8xf32> to vector<8x1xf32>
    %cst_11 = arith.constant 1.280000e+02 : f32
    %18 = vector.broadcast %cst_11 : f32 to vector<8x1xf32>
    %19 = arith.divf %17, %18 : vector<8x1xf32>
    %20 = vector.broadcast %12 : vector<8x1xf32> to vector<8x128xf32>
    %21 = arith.subf %4, %20 : vector<8x128xf32>
    %cst_12 = arith.constant 9.99999997E-7 : f32
    %22 = vector.broadcast %cst_12 : f32 to vector<8x1xf32>
    %23 = arith.addf %19, %22 : vector<8x1xf32>
    %24 = math.rsqrt %23 : vector<8x1xf32>
    %25 = vector.broadcast %24 : vector<8x1xf32> to vector<8x128xf32>
    %26 = arith.mulf %21, %25 : vector<8x128xf32>
    %27 = vector.broadcast %6 : vector<1x128xf32> to vector<8x128xf32>
    %28 = arith.mulf %26, %27 : vector<8x128xf32>
    %29 = vector.broadcast %8 : vector<1x128xf32> to vector<8x128xf32>
    %30 = arith.addf %28, %29 : vector<8x128xf32>
    %31 = arith.truncf %30 : vector<8x128xf32> to vector<8x128xbf16>
    %c0_13 = arith.constant 0 : index
    %c0_14 = arith.constant 0 : index
    %c0_15 = arith.constant 0 : index
    %c0_16 = arith.constant 0 : index
    %32 = vector.load %arg7[%c0_13, %c0_14, %c0_15, %c0_16] : memref<1x4x128x32xbf16, #tpu.memory_space<vmem>>, vector<1x1x128x32xbf16>
    %33 = vector.shape_cast %32 : vector<1x1x128x32xbf16> to vector<128x32xbf16>
    %cst_17 = arith.constant dense<0.000000e+00> : vector<8x32xf32>
    %34 = tpu.matmul %31, %33, %cst_17 {dimension_numbers = #tpu.dot_dimension_numbers<[1], [0], [0], [1], [0, 0, 1, 1], [], []>} : vector<8x128xbf16>, vector<128x32xbf16>, vector<8x32xf32> -> vector<8x32xf32>
    %c0_18 = arith.constant 0 : index
    %c0_19 = arith.constant 0 : index
    %c0_20 = arith.constant 0 : index
    %c0_21 = arith.constant 0 : index
    %35 = vector.load %arg8[%c0_18, %c0_19, %c0_20, %c0_21] : memref<1x4x1x32xf32, #tpu.memory_space<vmem>>, vector<1x1x1x32xf32>
    %36 = vector.shape_cast %35 : vector<1x1x1x32xf32> to vector<1x32xf32>
    %37 = vector.broadcast %36 : vector<1x32xf32> to vector<8x32xf32>
    %38 = arith.addf %34, %37 : vector<8x32xf32>
    %c0_22 = arith.constant 0 : index
    %c0_23 = arith.constant 0 : index
    %c0_24 = arith.constant 0 : index
    %c0_25 = arith.constant 0 : index
    %39 = vector.load %arg9[%c0_22, %c0_23, %c0_24, %c0_25] : memref<1x4x128x32xbf16, #tpu.memory_space<vmem>>, vector<1x1x128x32xbf16>
    %40 = vector.shape_cast %39 : vector<1x1x128x32xbf16> to vector<128x32xbf16>
    %cst_26 = arith.constant dense<0.000000e+00> : vector<8x32xf32>
    %41 = tpu.matmul %31, %40, %cst_26 {dimension_numbers = #tpu.dot_dimension_numbers<[1], [0], [0], [1], [0, 0, 1, 1], [], []>} : vector<8x128xbf16>, vector<128x32xbf16>, vector<8x32xf32> -> vector<8x32xf32>
    %c0_27 = arith.constant 0 : index
    %c0_28 = arith.constant 0 : index
    %c0_29 = arith.constant 0 : index
    %c0_30 = arith.constant 0 : index
    %42 = vector.load %arg10[%c0_27, %c0_28, %c0_29, %c0_30] : memref<1x4x1x32xf32, #tpu.memory_space<vmem>>, vector<1x1x1x32xf32>
    %43 = vector.shape_cast %42 : vector<1x1x1x32xf32> to vector<1x32xf32>
    %44 = vector.broadcast %43 : vector<1x32xf32> to vector<8x32xf32>
    %45 = arith.addf %41, %44 : vector<8x32xf32>
    %c0_31 = arith.constant 0 : index
    %c0_32 = arith.constant 0 : index
    %c0_33 = arith.constant 0 : index
    %c0_34 = arith.constant 0 : index
    %46 = vector.load %arg11[%c0_31, %c0_32, %c0_33, %c0_34] : memref<1x4x128x32xbf16, #tpu.memory_space<vmem>>, vector<1x1x128x32xbf16>
    %47 = vector.shape_cast %46 : vector<1x1x128x32xbf16> to vector<128x32xbf16>
    %cst_35 = arith.constant dense<0.000000e+00> : vector<8x32xf32>
    %48 = tpu.matmul %31, %47, %cst_35 {dimension_numbers = #tpu.dot_dimension_numbers<[1], [0], [0], [1], [0, 0, 1, 1], [], []>} : vector<8x128xbf16>, vector<128x32xbf16>, vector<8x32xf32> -> vector<8x32xf32>
    %c0_36 = arith.constant 0 : index
    %c0_37 = arith.constant 0 : index
    %c0_38 = arith.constant 0 : index
    %c0_39 = arith.constant 0 : index
    %49 = vector.load %arg12[%c0_36, %c0_37, %c0_38, %c0_39] : memref<1x4x1x32xf32, #tpu.memory_space<vmem>>, vector<1x1x1x32xf32>
    %50 = vector.shape_cast %49 : vector<1x1x1x32xf32> to vector<1x32xf32>
    %51 = vector.broadcast %50 : vector<1x32xf32> to vector<8x32xf32>
    %52 = arith.addf %48, %51 : vector<8x32xf32>
    %53 = arith.truncf %38 : vector<8x32xf32> to vector<8x32xbf16>
    %54 = arith.truncf %45 : vector<8x32xf32> to vector<8x32xbf16>
    %cst_40 = arith.constant dense<0.000000e+00> : vector<8x8xf32>
    %55 = tpu.matmul %53, %54, %cst_40 {dimension_numbers = #tpu.dot_dimension_numbers<[1], [1], [0], [0], [0, 0, 1, 0], [], []>} : vector<8x32xbf16>, vector<8x32xbf16>, vector<8x8xf32> -> vector<8x8xf32>
    %cst_41 = arith.constant 0.176776692 : f32
    %56 = vector.broadcast %cst_41 : f32 to vector<8x8xf32>
    %57 = arith.mulf %55, %56 : vector<8x8xf32>
    %cst_42 = arith.constant dense<0xFF800000> : vector<8xf32>
    %58 = vector.multi_reduction <maximumf>, %57, %cst_42 [1] : vector<8x8xf32> to vector<8xf32>
    %59 = vector.shape_cast %58 : vector<8xf32> to vector<8x1xf32>
    %60 = vector.broadcast %59 : vector<8x1xf32> to vector<8x8xf32>
    %61 = arith.subf %57, %60 : vector<8x8xf32>
    %62 = math.exp %61 : vector<8x8xf32>
    %cst_43 = arith.constant dense<0.000000e+00> : vector<8xf32>
    %63 = vector.multi_reduction <add>, %62, %cst_43 [1] : vector<8x8xf32> to vector<8xf32>
    %64 = vector.shape_cast %63 : vector<8xf32> to vector<8x1xf32>
    %65 = tpu.reciprocal %64 {approx = true} : vector<8x1xf32> -> vector<8x1xf32>
    %66 = vector.broadcast %65 : vector<8x1xf32> to vector<8x8xf32>
    %67 = arith.mulf %62, %66 : vector<8x8xf32>
    %68 = arith.truncf %67 : vector<8x8xf32> to vector<8x8xbf16>
    %69 = arith.truncf %52 : vector<8x32xf32> to vector<8x32xbf16>
    %cst_44 = arith.constant dense<0.000000e+00> : vector<8x32xf32>
    %70 = tpu.matmul %68, %69, %cst_44 {dimension_numbers = #tpu.dot_dimension_numbers<[1], [0], [0], [1], [0, 0, 1, 1], [], []>} : vector<8x8xbf16>, vector<8x32xbf16>, vector<8x32xf32> -> vector<8x32xf32>
    %c0_45 = arith.constant 0 : index
    %c1 = arith.constant 1 : index
    %c0_46 = arith.constant 0 : index
    %c0_47 = arith.constant 0 : index
    %71 = vector.load %arg7[%c0_45, %c1, %c0_46, %c0_47] : memref<1x4x128x32xbf16, #tpu.memory_space<vmem>>, vector<1x1x128x32xbf16>
    %72 = vector.shape_cast %71 : vector<1x1x128x32xbf16> to vector<128x32xbf16>
    %cst_48 = arith.constant dense<0.000000e+00> : vector<8x32xf32>
    %73 = tpu.matmul %31, %72, %cst_48 {dimension_numbers = #tpu.dot_dimension_numbers<[1], [0], [0], [1], [0, 0, 1, 1], [], []>} : vector<8x128xbf16>, vector<128x32xbf16>, vector<8x32xf32> -> vector<8x32xf32>
    %c0_49 = arith.constant 0 : index
    %c1_50 = arith.constant 1 : index
    %c0_51 = arith.constant 0 : index
    %c0_52 = arith.constant 0 : index
    %74 = vector.load %arg8[%c0_49, %c1_50, %c0_51, %c0_52] : memref<1x4x1x32xf32, #tpu.memory_space<vmem>>, vector<1x1x1x32xf32>
    %75 = vector.shape_cast %74 : vector<1x1x1x32xf32> to vector<1x32xf32>
    %76 = vector.broadcast %75 : vector<1x32xf32> to vector<8x32xf32>
    %77 = arith.addf %73, %76 : vector<8x32xf32>
    %c0_53 = arith.constant 0 : index
    %c1_54 = arith.constant 1 : index
    %c0_55 = arith.constant 0 : index
    %c0_56 = arith.constant 0 : index
    %78 = vector.load %arg9[%c0_53, %c1_54, %c0_55, %c0_56] : memref<1x4x128x32xbf16, #tpu.memory_space<vmem>>, vector<1x1x128x32xbf16>
    %79 = vector.shape_cast %78 : vector<1x1x128x32xbf16> to vector<128x32xbf16>
    %cst_57 = arith.constant dense<0.000000e+00> : vector<8x32xf32>
    %80 = tpu.matmul %31, %79, %cst_57 {dimension_numbers = #tpu.dot_dimension_numbers<[1], [0], [0], [1], [0, 0, 1, 1], [], []>} : vector<8x128xbf16>, vector<128x32xbf16>, vector<8x32xf32> -> vector<8x32xf32>
    %c0_58 = arith.constant 0 : index
    %c1_59 = arith.constant 1 : index
    %c0_60 = arith.constant 0 : index
    %c0_61 = arith.constant 0 : index
    %81 = vector.load %arg10[%c0_58, %c1_59, %c0_60, %c0_61] : memref<1x4x1x32xf32, #tpu.memory_space<vmem>>, vector<1x1x1x32xf32>
    %82 = vector.shape_cast %81 : vector<1x1x1x32xf32> to vector<1x32xf32>
    %83 = vector.broadcast %82 : vector<1x32xf32> to vector<8x32xf32>
    %84 = arith.addf %80, %83 : vector<8x32xf32>
    %c0_62 = arith.constant 0 : index
    %c1_63 = arith.constant 1 : index
    %c0_64 = arith.constant 0 : index
    %c0_65 = arith.constant 0 : index
    %85 = vector.load %arg11[%c0_62, %c1_63, %c0_64, %c0_65] : memref<1x4x128x32xbf16, #tpu.memory_space<vmem>>, vector<1x1x128x32xbf16>
    %86 = vector.shape_cast %85 : vector<1x1x128x32xbf16> to vector<128x32xbf16>
    %cst_66 = arith.constant dense<0.000000e+00> : vector<8x32xf32>
    %87 = tpu.matmul %31, %86, %cst_66 {dimension_numbers = #tpu.dot_dimension_numbers<[1], [0], [0], [1], [0, 0, 1, 1], [], []>} : vector<8x128xbf16>, vector<128x32xbf16>, vector<8x32xf32> -> vector<8x32xf32>
    %c0_67 = arith.constant 0 : index
    %c1_68 = arith.constant 1 : index
    %c0_69 = arith.constant 0 : index
    %c0_70 = arith.constant 0 : index
    %88 = vector.load %arg12[%c0_67, %c1_68, %c0_69, %c0_70] : memref<1x4x1x32xf32, #tpu.memory_space<vmem>>, vector<1x1x1x32xf32>
    %89 = vector.shape_cast %88 : vector<1x1x1x32xf32> to vector<1x32xf32>
    %90 = vector.broadcast %89 : vector<1x32xf32> to vector<8x32xf32>
    %91 = arith.addf %87, %90 : vector<8x32xf32>
    %92 = arith.truncf %77 : vector<8x32xf32> to vector<8x32xbf16>
    %93 = arith.truncf %84 : vector<8x32xf32> to vector<8x32xbf16>
    %cst_71 = arith.constant dense<0.000000e+00> : vector<8x8xf32>
    %94 = tpu.matmul %92, %93, %cst_71 {dimension_numbers = #tpu.dot_dimension_numbers<[1], [1], [0], [0], [0, 0, 1, 0], [], []>} : vector<8x32xbf16>, vector<8x32xbf16>, vector<8x8xf32> -> vector<8x8xf32>
    %cst_72 = arith.constant 0.176776692 : f32
    %95 = vector.broadcast %cst_72 : f32 to vector<8x8xf32>
    %96 = arith.mulf %94, %95 : vector<8x8xf32>
    %cst_73 = arith.constant dense<0xFF800000> : vector<8xf32>
    %97 = vector.multi_reduction <maximumf>, %96, %cst_73 [1] : vector<8x8xf32> to vector<8xf32>
    %98 = vector.shape_cast %97 : vector<8xf32> to vector<8x1xf32>
    %99 = vector.broadcast %98 : vector<8x1xf32> to vector<8x8xf32>
    %100 = arith.subf %96, %99 : vector<8x8xf32>
    %101 = math.exp %100 : vector<8x8xf32>
    %cst_74 = arith.constant dense<0.000000e+00> : vector<8xf32>
    %102 = vector.multi_reduction <add>, %101, %cst_74 [1] : vector<8x8xf32> to vector<8xf32>
    %103 = vector.shape_cast %102 : vector<8xf32> to vector<8x1xf32>
    %104 = tpu.reciprocal %103 {approx = true} : vector<8x1xf32> -> vector<8x1xf32>
    %105 = vector.broadcast %104 : vector<8x1xf32> to vector<8x8xf32>
    %106 = arith.mulf %101, %105 : vector<8x8xf32>
    %107 = arith.truncf %106 : vector<8x8xf32> to vector<8x8xbf16>
    %108 = arith.truncf %91 : vector<8x32xf32> to vector<8x32xbf16>
    %cst_75 = arith.constant dense<0.000000e+00> : vector<8x32xf32>
    %109 = tpu.matmul %107, %108, %cst_75 {dimension_numbers = #tpu.dot_dimension_numbers<[1], [0], [0], [1], [0, 0, 1, 1], [], []>} : vector<8x8xbf16>, vector<8x32xbf16>, vector<8x32xf32> -> vector<8x32xf32>
    %c0_76 = arith.constant 0 : index
    %c2 = arith.constant 2 : index
    %c0_77 = arith.constant 0 : index
    %c0_78 = arith.constant 0 : index
    %110 = vector.load %arg7[%c0_76, %c2, %c0_77, %c0_78] : memref<1x4x128x32xbf16, #tpu.memory_space<vmem>>, vector<1x1x128x32xbf16>
    %111 = vector.shape_cast %110 : vector<1x1x128x32xbf16> to vector<128x32xbf16>
    %cst_79 = arith.constant dense<0.000000e+00> : vector<8x32xf32>
    %112 = tpu.matmul %31, %111, %cst_79 {dimension_numbers = #tpu.dot_dimension_numbers<[1], [0], [0], [1], [0, 0, 1, 1], [], []>} : vector<8x128xbf16>, vector<128x32xbf16>, vector<8x32xf32> -> vector<8x32xf32>
    %c0_80 = arith.constant 0 : index
    %c2_81 = arith.constant 2 : index
    %c0_82 = arith.constant 0 : index
    %c0_83 = arith.constant 0 : index
    %113 = vector.load %arg8[%c0_80, %c2_81, %c0_82, %c0_83] : memref<1x4x1x32xf32, #tpu.memory_space<vmem>>, vector<1x1x1x32xf32>
    %114 = vector.shape_cast %113 : vector<1x1x1x32xf32> to vector<1x32xf32>
    %115 = vector.broadcast %114 : vector<1x32xf32> to vector<8x32xf32>
    %116 = arith.addf %112, %115 : vector<8x32xf32>
    %c0_84 = arith.constant 0 : index
    %c2_85 = arith.constant 2 : index
    %c0_86 = arith.constant 0 : index
    %c0_87 = arith.constant 0 : index
    %117 = vector.load %arg9[%c0_84, %c2_85, %c0_86, %c0_87] : memref<1x4x128x32xbf16, #tpu.memory_space<vmem>>, vector<1x1x128x32xbf16>
    %118 = vector.shape_cast %117 : vector<1x1x128x32xbf16> to vector<128x32xbf16>
    %cst_88 = arith.constant dense<0.000000e+00> : vector<8x32xf32>
    %119 = tpu.matmul %31, %118, %cst_88 {dimension_numbers = #tpu.dot_dimension_numbers<[1], [0], [0], [1], [0, 0, 1, 1], [], []>} : vector<8x128xbf16>, vector<128x32xbf16>, vector<8x32xf32> -> vector<8x32xf32>
    %c0_89 = arith.constant 0 : index
    %c2_90 = arith.constant 2 : index
    %c0_91 = arith.constant 0 : index
    %c0_92 = arith.constant 0 : index
    %120 = vector.load %arg10[%c0_89, %c2_90, %c0_91, %c0_92] : memref<1x4x1x32xf32, #tpu.memory_space<vmem>>, vector<1x1x1x32xf32>
    %121 = vector.shape_cast %120 : vector<1x1x1x32xf32> to vector<1x32xf32>
    %122 = vector.broadcast %121 : vector<1x32xf32> to vector<8x32xf32>
    %123 = arith.addf %119, %122 : vector<8x32xf32>
    %c0_93 = arith.constant 0 : index
    %c2_94 = arith.constant 2 : index
    %c0_95 = arith.constant 0 : index
    %c0_96 = arith.constant 0 : index
    %124 = vector.load %arg11[%c0_93, %c2_94, %c0_95, %c0_96] : memref<1x4x128x32xbf16, #tpu.memory_space<vmem>>, vector<1x1x128x32xbf16>
    %125 = vector.shape_cast %124 : vector<1x1x128x32xbf16> to vector<128x32xbf16>
    %cst_97 = arith.constant dense<0.000000e+00> : vector<8x32xf32>
    %126 = tpu.matmul %31, %125, %cst_97 {dimension_numbers = #tpu.dot_dimension_numbers<[1], [0], [0], [1], [0, 0, 1, 1], [], []>} : vector<8x128xbf16>, vector<128x32xbf16>, vector<8x32xf32> -> vector<8x32xf32>
    %c0_98 = arith.constant 0 : index
    %c2_99 = arith.constant 2 : index
    %c0_100 = arith.constant 0 : index
    %c0_101 = arith.constant 0 : index
    %127 = vector.load %arg12[%c0_98, %c2_99, %c0_100, %c0_101] : memref<1x4x1x32xf32, #tpu.memory_space<vmem>>, vector<1x1x1x32xf32>
    %128 = vector.shape_cast %127 : vector<1x1x1x32xf32> to vector<1x32xf32>
    %129 = vector.broadcast %128 : vector<1x32xf32> to vector<8x32xf32>
    %130 = arith.addf %126, %129 : vector<8x32xf32>
    %131 = arith.truncf %116 : vector<8x32xf32> to vector<8x32xbf16>
    %132 = arith.truncf %123 : vector<8x32xf32> to vector<8x32xbf16>
    %cst_102 = arith.constant dense<0.000000e+00> : vector<8x8xf32>
    %133 = tpu.matmul %131, %132, %cst_102 {dimension_numbers = #tpu.dot_dimension_numbers<[1], [1], [0], [0], [0, 0, 1, 0], [], []>} : vector<8x32xbf16>, vector<8x32xbf16>, vector<8x8xf32> -> vector<8x8xf32>
    %cst_103 = arith.constant 0.176776692 : f32
    %134 = vector.broadcast %cst_103 : f32 to vector<8x8xf32>
    %135 = arith.mulf %133, %134 : vector<8x8xf32>
    %cst_104 = arith.constant dense<0xFF800000> : vector<8xf32>
    %136 = vector.multi_reduction <maximumf>, %135, %cst_104 [1] : vector<8x8xf32> to vector<8xf32>
    %137 = vector.shape_cast %136 : vector<8xf32> to vector<8x1xf32>
    %138 = vector.broadcast %137 : vector<8x1xf32> to vector<8x8xf32>
    %139 = arith.subf %135, %138 : vector<8x8xf32>
    %140 = math.exp %139 : vector<8x8xf32>
    %cst_105 = arith.constant dense<0.000000e+00> : vector<8xf32>
    %141 = vector.multi_reduction <add>, %140, %cst_105 [1] : vector<8x8xf32> to vector<8xf32>
    %142 = vector.shape_cast %141 : vector<8xf32> to vector<8x1xf32>
    %143 = tpu.reciprocal %142 {approx = true} : vector<8x1xf32> -> vector<8x1xf32>
    %144 = vector.broadcast %143 : vector<8x1xf32> to vector<8x8xf32>
    %145 = arith.mulf %140, %144 : vector<8x8xf32>
    %146 = arith.truncf %145 : vector<8x8xf32> to vector<8x8xbf16>
    %147 = arith.truncf %130 : vector<8x32xf32> to vector<8x32xbf16>
    %cst_106 = arith.constant dense<0.000000e+00> : vector<8x32xf32>
    %148 = tpu.matmul %146, %147, %cst_106 {dimension_numbers = #tpu.dot_dimension_numbers<[1], [0], [0], [1], [0, 0, 1, 1], [], []>} : vector<8x8xbf16>, vector<8x32xbf16>, vector<8x32xf32> -> vector<8x32xf32>
    %c0_107 = arith.constant 0 : index
    %c3 = arith.constant 3 : index
    %c0_108 = arith.constant 0 : index
    %c0_109 = arith.constant 0 : index
    %149 = vector.load %arg7[%c0_107, %c3, %c0_108, %c0_109] : memref<1x4x128x32xbf16, #tpu.memory_space<vmem>>, vector<1x1x128x32xbf16>
    %150 = vector.shape_cast %149 : vector<1x1x128x32xbf16> to vector<128x32xbf16>
    %cst_110 = arith.constant dense<0.000000e+00> : vector<8x32xf32>
    %151 = tpu.matmul %31, %150, %cst_110 {dimension_numbers = #tpu.dot_dimension_numbers<[1], [0], [0], [1], [0, 0, 1, 1], [], []>} : vector<8x128xbf16>, vector<128x32xbf16>, vector<8x32xf32> -> vector<8x32xf32>
    %c0_111 = arith.constant 0 : index
    %c3_112 = arith.constant 3 : index
    %c0_113 = arith.constant 0 : index
    %c0_114 = arith.constant 0 : index
    %152 = vector.load %arg8[%c0_111, %c3_112, %c0_113, %c0_114] : memref<1x4x1x32xf32, #tpu.memory_space<vmem>>, vector<1x1x1x32xf32>
    %153 = vector.shape_cast %152 : vector<1x1x1x32xf32> to vector<1x32xf32>
    %154 = vector.broadcast %153 : vector<1x32xf32> to vector<8x32xf32>
    %155 = arith.addf %151, %154 : vector<8x32xf32>
    %c0_115 = arith.constant 0 : index
    %c3_116 = arith.constant 3 : index
    %c0_117 = arith.constant 0 : index
    %c0_118 = arith.constant 0 : index
    %156 = vector.load %arg9[%c0_115, %c3_116, %c0_117, %c0_118] : memref<1x4x128x32xbf16, #tpu.memory_space<vmem>>, vector<1x1x128x32xbf16>
    %157 = vector.shape_cast %156 : vector<1x1x128x32xbf16> to vector<128x32xbf16>
    %cst_119 = arith.constant dense<0.000000e+00> : vector<8x32xf32>
    %158 = tpu.matmul %31, %157, %cst_119 {dimension_numbers = #tpu.dot_dimension_numbers<[1], [0], [0], [1], [0, 0, 1, 1], [], []>} : vector<8x128xbf16>, vector<128x32xbf16>, vector<8x32xf32> -> vector<8x32xf32>
    %c0_120 = arith.constant 0 : index
    %c3_121 = arith.constant 3 : index
    %c0_122 = arith.constant 0 : index
    %c0_123 = arith.constant 0 : index
    %159 = vector.load %arg10[%c0_120, %c3_121, %c0_122, %c0_123] : memref<1x4x1x32xf32, #tpu.memory_space<vmem>>, vector<1x1x1x32xf32>
    %160 = vector.shape_cast %159 : vector<1x1x1x32xf32> to vector<1x32xf32>
    %161 = vector.broadcast %160 : vector<1x32xf32> to vector<8x32xf32>
    %162 = arith.addf %158, %161 : vector<8x32xf32>
    %c0_124 = arith.constant 0 : index
    %c3_125 = arith.constant 3 : index
    %c0_126 = arith.constant 0 : index
    %c0_127 = arith.constant 0 : index
    %163 = vector.load %arg11[%c0_124, %c3_125, %c0_126, %c0_127] : memref<1x4x128x32xbf16, #tpu.memory_space<vmem>>, vector<1x1x128x32xbf16>
    %164 = vector.shape_cast %163 : vector<1x1x128x32xbf16> to vector<128x32xbf16>
    %cst_128 = arith.constant dense<0.000000e+00> : vector<8x32xf32>
    %165 = tpu.matmul %31, %164, %cst_128 {dimension_numbers = #tpu.dot_dimension_numbers<[1], [0], [0], [1], [0, 0, 1, 1], [], []>} : vector<8x128xbf16>, vector<128x32xbf16>, vector<8x32xf32> -> vector<8x32xf32>
    %c0_129 = arith.constant 0 : index
    %c3_130 = arith.constant 3 : index
    %c0_131 = arith.constant 0 : index
    %c0_132 = arith.constant 0 : index
    %166 = vector.load %arg12[%c0_129, %c3_130, %c0_131, %c0_132] : memref<1x4x1x32xf32, #tpu.memory_space<vmem>>, vector<1x1x1x32xf32>
    %167 = vector.shape_cast %166 : vector<1x1x1x32xf32> to vector<1x32xf32>
    %168 = vector.broadcast %167 : vector<1x32xf32> to vector<8x32xf32>
    %169 = arith.addf %165, %168 : vector<8x32xf32>
    %170 = arith.truncf %155 : vector<8x32xf32> to vector<8x32xbf16>
    %171 = arith.truncf %162 : vector<8x32xf32> to vector<8x32xbf16>
    %cst_133 = arith.constant dense<0.000000e+00> : vector<8x8xf32>
    %172 = tpu.matmul %170, %171, %cst_133 {dimension_numbers = #tpu.dot_dimension_numbers<[1], [1], [0], [0], [0, 0, 1, 0], [], []>} : vector<8x32xbf16>, vector<8x32xbf16>, vector<8x8xf32> -> vector<8x8xf32>
    %cst_134 = arith.constant 0.176776692 : f32
    %173 = vector.broadcast %cst_134 : f32 to vector<8x8xf32>
    %174 = arith.mulf %172, %173 : vector<8x8xf32>
    %cst_135 = arith.constant dense<0xFF800000> : vector<8xf32>
    %175 = vector.multi_reduction <maximumf>, %174, %cst_135 [1] : vector<8x8xf32> to vector<8xf32>
    %176 = vector.shape_cast %175 : vector<8xf32> to vector<8x1xf32>
    %177 = vector.broadcast %176 : vector<8x1xf32> to vector<8x8xf32>
    %178 = arith.subf %174, %177 : vector<8x8xf32>
    %179 = math.exp %178 : vector<8x8xf32>
    %cst_136 = arith.constant dense<0.000000e+00> : vector<8xf32>
    %180 = vector.multi_reduction <add>, %179, %cst_136 [1] : vector<8x8xf32> to vector<8xf32>
    %181 = vector.shape_cast %180 : vector<8xf32> to vector<8x1xf32>
    %182 = tpu.reciprocal %181 {approx = true} : vector<8x1xf32> -> vector<8x1xf32>
    %183 = vector.broadcast %182 : vector<8x1xf32> to vector<8x8xf32>
    %184 = arith.mulf %179, %183 : vector<8x8xf32>
    %185 = arith.truncf %184 : vector<8x8xf32> to vector<8x8xbf16>
    %186 = arith.truncf %169 : vector<8x32xf32> to vector<8x32xbf16>
    %cst_137 = arith.constant dense<0.000000e+00> : vector<8x32xf32>
    %187 = tpu.matmul %185, %186, %cst_137 {dimension_numbers = #tpu.dot_dimension_numbers<[1], [0], [0], [1], [0, 0, 1, 1], [], []>} : vector<8x8xbf16>, vector<8x32xbf16>, vector<8x32xf32> -> vector<8x32xf32>
    %188 = tpu.concatenate %70, %109, %148, %187 in 1 : vector<8x32xf32>, vector<8x32xf32>, vector<8x32xf32>, vector<8x32xf32> -> vector<8x128xf32>
    %189 = arith.truncf %188 : vector<8x128xf32> to vector<8x128xbf16>
    %c0_138 = arith.constant 0 : index
    %c0_139 = arith.constant 0 : index
    %c0_140 = arith.constant 0 : index
    %190 = vector.load %arg13[%c0_138, %c0_139, %c0_140] : memref<1x128x128xbf16, #tpu.memory_space<vmem>>, vector<1x128x128xbf16>
    %191 = vector.shape_cast %190 : vector<1x128x128xbf16> to vector<128x128xbf16>
    %cst_141 = arith.constant dense<0.000000e+00> : vector<8x128xf32>
    %192 = tpu.matmul %189, %191, %cst_141 {dimension_numbers = #tpu.dot_dimension_numbers<[1], [0], [0], [1], [0, 0, 1, 1], [], []>} : vector<8x128xbf16>, vector<128x128xbf16>, vector<8x128xf32> -> vector<8x128xf32>
    %c0_142 = arith.constant 0 : index
    %c0_143 = arith.constant 0 : index
    %c0_144 = arith.constant 0 : index
    %193 = vector.load %arg14[%c0_142, %c0_143, %c0_144] : memref<1x1x128xf32, #tpu.memory_space<vmem>>, vector<1x1x128xf32>
    %194 = vector.shape_cast %193 : vector<1x1x128xf32> to vector<1x128xf32>
    %195 = vector.broadcast %194 : vector<1x128xf32> to vector<8x128xf32>
    %196 = arith.addf %192, %195 : vector<8x128xf32>
    %197 = arith.addf %4, %196 : vector<8x128xf32>
    %c0_145 = arith.constant 0 : index
    %c0_146 = arith.constant 0 : index
    %c0_147 = arith.constant 0 : index
    %198 = vector.load %arg15[%c0_145, %c0_146, %c0_147] : memref<1x1x128xf32, #tpu.memory_space<vmem>>, vector<1x1x128xf32>
    %199 = vector.shape_cast %198 : vector<1x1x128xf32> to vector<1x128xf32>
    %c0_148 = arith.constant 0 : index
    %c0_149 = arith.constant 0 : index
    %c0_150 = arith.constant 0 : index
    %200 = vector.load %arg16[%c0_148, %c0_149, %c0_150] : memref<1x1x128xf32, #tpu.memory_space<vmem>>, vector<1x1x128xf32>
    %201 = vector.shape_cast %200 : vector<1x1x128xf32> to vector<1x128xf32>
    %cst_151 = arith.constant dense<0.000000e+00> : vector<8xf32>
    %202 = vector.multi_reduction <add>, %197, %cst_151 [1] : vector<8x128xf32> to vector<8xf32>
    %203 = vector.shape_cast %202 : vector<8xf32> to vector<8x1xf32>
    %cst_152 = arith.constant 1.280000e+02 : f32
    %204 = vector.broadcast %cst_152 : f32 to vector<8x1xf32>
    %205 = arith.divf %203, %204 : vector<8x1xf32>
    %206 = vector.broadcast %205 : vector<8x1xf32> to vector<8x128xf32>
    %207 = arith.subf %197, %206 : vector<8x128xf32>
    %208 = arith.mulf %207, %207 : vector<8x128xf32>
    %cst_153 = arith.constant dense<0.000000e+00> : vector<8xf32>
    %209 = vector.multi_reduction <add>, %208, %cst_153 [1] : vector<8x128xf32> to vector<8xf32>
    %210 = vector.shape_cast %209 : vector<8xf32> to vector<8x1xf32>
    %cst_154 = arith.constant 1.280000e+02 : f32
    %211 = vector.broadcast %cst_154 : f32 to vector<8x1xf32>
    %212 = arith.divf %210, %211 : vector<8x1xf32>
    %213 = vector.broadcast %205 : vector<8x1xf32> to vector<8x128xf32>
    %214 = arith.subf %197, %213 : vector<8x128xf32>
    %cst_155 = arith.constant 9.99999997E-7 : f32
    %215 = vector.broadcast %cst_155 : f32 to vector<8x1xf32>
    %216 = arith.addf %212, %215 : vector<8x1xf32>
    %217 = math.rsqrt %216 : vector<8x1xf32>
    %218 = vector.broadcast %217 : vector<8x1xf32> to vector<8x128xf32>
    %219 = arith.mulf %214, %218 : vector<8x128xf32>
    %220 = vector.broadcast %199 : vector<1x128xf32> to vector<8x128xf32>
    %221 = arith.mulf %219, %220 : vector<8x128xf32>
    %222 = vector.broadcast %201 : vector<1x128xf32> to vector<8x128xf32>
    %223 = arith.addf %221, %222 : vector<8x128xf32>
    %224 = arith.truncf %223 : vector<8x128xf32> to vector<8x128xbf16>
    %c0_156 = arith.constant 0 : index
    %c0_157 = arith.constant 0 : index
    %c0_158 = arith.constant 0 : index
    %225 = vector.load %arg17[%c0_156, %c0_157, %c0_158] : memref<1x128x512xbf16, #tpu.memory_space<vmem>>, vector<1x128x512xbf16>
    %226 = vector.shape_cast %225 : vector<1x128x512xbf16> to vector<128x512xbf16>
    %cst_159 = arith.constant dense<0.000000e+00> : vector<8x512xf32>
    %227 = tpu.matmul %224, %226, %cst_159 {dimension_numbers = #tpu.dot_dimension_numbers<[1], [0], [0], [1], [0, 0, 1, 1], [], []>} : vector<8x128xbf16>, vector<128x512xbf16>, vector<8x512xf32> -> vector<8x512xf32>
    %c0_160 = arith.constant 0 : index
    %c0_161 = arith.constant 0 : index
    %c0_162 = arith.constant 0 : index
    %228 = vector.load %arg18[%c0_160, %c0_161, %c0_162] : memref<1x1x512xf32, #tpu.memory_space<vmem>>, vector<1x1x512xf32>
    %229 = vector.shape_cast %228 : vector<1x1x512xf32> to vector<1x512xf32>
    %230 = vector.broadcast %229 : vector<1x512xf32> to vector<8x512xf32>
    %231 = arith.addf %227, %230 : vector<8x512xf32>
    %cst_163 = arith.constant 5.000000e-01 : f32
    %232 = vector.broadcast %cst_163 : f32 to vector<8x512xf32>
    %233 = arith.mulf %232, %231 : vector<8x512xf32>
    %cst_164 = arith.constant 0.707106769 : f32
    %234 = vector.broadcast %cst_164 : f32 to vector<8x512xf32>
    %235 = arith.mulf %231, %234 : vector<8x512xf32>
    %cst_165 = arith.constant 0.000000e+00 : f32
    %236 = vector.broadcast %cst_165 : f32 to vector<8x512xf32>
    %237 = arith.cmpf olt, %235, %236 : vector<8x512xf32>
    %cst_166 = arith.constant -1.000000e+00 : f32
    %cst_167 = arith.constant 1.000000e+00 : f32
    %238 = vector.broadcast %cst_166 : f32 to vector<8x512xf32>
    %239 = vector.broadcast %cst_167 : f32 to vector<8x512xf32>
    %240 = arith.select %237, %238, %239 : vector<8x512xi1>, vector<8x512xf32>
    %241 = math.absf %235 : vector<8x512xf32>
    %cst_168 = arith.constant 0.327591091 : f32
    %242 = vector.broadcast %cst_168 : f32 to vector<8x512xf32>
    %243 = arith.mulf %242, %241 : vector<8x512xf32>
    %cst_169 = arith.constant 1.000000e+00 : f32
    %244 = vector.broadcast %cst_169 : f32 to vector<8x512xf32>
    %245 = arith.addf %244, %243 : vector<8x512xf32>
    %cst_170 = arith.constant 1.000000e+00 : f32
    %246 = vector.broadcast %cst_170 : f32 to vector<8x512xf32>
    %247 = arith.divf %246, %245 : vector<8x512xf32>
    %cst_171 = arith.constant 1.06140542 : f32
    %248 = vector.broadcast %cst_171 : f32 to vector<8x512xf32>
    %249 = arith.mulf %248, %247 : vector<8x512xf32>
    %cst_172 = arith.constant -1.45315206 : f32
    %250 = vector.broadcast %cst_172 : f32 to vector<8x512xf32>
    %251 = arith.addf %249, %250 : vector<8x512xf32>
    %252 = arith.mulf %251, %247 : vector<8x512xf32>
    %cst_173 = arith.constant 1.42141378 : f32
    %253 = vector.broadcast %cst_173 : f32 to vector<8x512xf32>
    %254 = arith.addf %252, %253 : vector<8x512xf32>
    %255 = arith.mulf %254, %247 : vector<8x512xf32>
    %cst_174 = arith.constant -0.284496725 : f32
    %256 = vector.broadcast %cst_174 : f32 to vector<8x512xf32>
    %257 = arith.addf %255, %256 : vector<8x512xf32>
    %258 = arith.mulf %257, %247 : vector<8x512xf32>
    %cst_175 = arith.constant 0.254829586 : f32
    %259 = vector.broadcast %cst_175 : f32 to vector<8x512xf32>
    %260 = arith.addf %258, %259 : vector<8x512xf32>
    %261 = arith.mulf %260, %247 : vector<8x512xf32>
    %cst_176 = arith.constant 0.000000e+00 : f32
    %262 = vector.broadcast %cst_176 : f32 to vector<8x512xf32>
    %263 = arith.subf %262, %241 : vector<8x512xf32>
    %264 = arith.mulf %263, %241 : vector<8x512xf32>
    %265 = math.exp %264 : vector<8x512xf32>
    %266 = arith.mulf %261, %265 : vector<8x512xf32>
    %cst_177 = arith.constant 1.000000e+00 : f32
    %267 = vector.broadcast %cst_177 : f32 to vector<8x512xf32>
    %268 = arith.subf %267, %266 : vector<8x512xf32>
    %269 = arith.mulf %240, %268 : vector<8x512xf32>
    %cst_178 = arith.constant 1.000000e+00 : f32
    %270 = vector.broadcast %cst_178 : f32 to vector<8x512xf32>
    %271 = arith.addf %270, %269 : vector<8x512xf32>
    %272 = arith.mulf %233, %271 : vector<8x512xf32>
    %273 = arith.truncf %272 : vector<8x512xf32> to vector<8x512xbf16>
    %c0_179 = arith.constant 0 : index
    %c0_180 = arith.constant 0 : index
    %c0_181 = arith.constant 0 : index
    %274 = vector.load %arg19[%c0_179, %c0_180, %c0_181] : memref<1x512x128xbf16, #tpu.memory_space<vmem>>, vector<1x512x128xbf16>
    %275 = vector.shape_cast %274 : vector<1x512x128xbf16> to vector<512x128xbf16>
    %cst_182 = arith.constant dense<0.000000e+00> : vector<8x128xf32>
    %276 = tpu.matmul %273, %275, %cst_182 {dimension_numbers = #tpu.dot_dimension_numbers<[1], [0], [0], [1], [0, 0, 1, 1], [], []>} : vector<8x512xbf16>, vector<512x128xbf16>, vector<8x128xf32> -> vector<8x128xf32>
    %c0_183 = arith.constant 0 : index
    %c0_184 = arith.constant 0 : index
    %c0_185 = arith.constant 0 : index
    %277 = vector.load %arg20[%c0_183, %c0_184, %c0_185] : memref<1x1x128xf32, #tpu.memory_space<vmem>>, vector<1x1x128xf32>
    %278 = vector.shape_cast %277 : vector<1x1x128xf32> to vector<1x128xf32>
    %279 = vector.broadcast %278 : vector<1x128xf32> to vector<8x128xf32>
    %280 = arith.addf %276, %279 : vector<8x128xf32>
    %281 = arith.addf %197, %280 : vector<8x128xf32>
    %c0_186 = arith.constant 0 : index
    %c0_187 = arith.constant 0 : index
    %c0_188 = arith.constant 0 : index
    %282 = vector.load %arg23[%c0_186, %c0_187, %c0_188] : memref<1x8x128xf32, #tpu.memory_space<vmem>>, vector<1x8x128xf32>
    %283 = vector.shape_cast %282 : vector<1x8x128xf32> to vector<8x128xf32>
    %284 = vector.shape_cast %281 : vector<8x128xf32> to vector<1x8x128xf32>
    tpu.vector_store %arg23[%c0_186, %c0_187, %c0_188], %284 {strides = array<i32>} : memref<1x8x128xf32, #tpu.memory_space<vmem>>, vector<1x8x128xf32>,
    %c1_i32 = arith.constant 1 : i32
    %285 = arith.cmpi eq, %arg1, %c1_i32 : i32
    %286 = arith.extui %285 : i1 to i32
    %c0_i32_189 = arith.constant 0 : i32
    %287 = arith.cmpi ne, %286, %c0_i32_189 : i32
    scf.if %287 {
      %c0_190 = arith.constant 0 : index
      %c0_191 = arith.constant 0 : index
      %288 = vector.load %arg21[%c0_190, %c0_191] : memref<1x128xf32, #tpu.memory_space<vmem>>, vector<1x128xf32>
      %c0_192 = arith.constant 0 : index
      %c0_193 = arith.constant 0 : index
      %289 = vector.load %arg22[%c0_192, %c0_193] : memref<1x128xf32, #tpu.memory_space<vmem>>, vector<1x128xf32>
      %cst_194 = arith.constant dense<0.000000e+00> : vector<8xf32>
      %290 = vector.multi_reduction <add>, %281, %cst_194 [1] : vector<8x128xf32> to vector<8xf32>
      %291 = vector.shape_cast %290 : vector<8xf32> to vector<8x1xf32>
      %cst_195 = arith.constant 1.280000e+02 : f32
      %292 = vector.broadcast %cst_195 : f32 to vector<8x1xf32>
      %293 = arith.divf %291, %292 : vector<8x1xf32>
      %294 = vector.broadcast %293 : vector<8x1xf32> to vector<8x128xf32>
      %295 = arith.subf %281, %294 : vector<8x128xf32>
      %296 = arith.mulf %295, %295 : vector<8x128xf32>
      %cst_196 = arith.constant dense<0.000000e+00> : vector<8xf32>
      %297 = vector.multi_reduction <add>, %296, %cst_196 [1] : vector<8x128xf32> to vector<8xf32>
      %298 = vector.shape_cast %297 : vector<8xf32> to vector<8x1xf32>
      %cst_197 = arith.constant 1.280000e+02 : f32
      %299 = vector.broadcast %cst_197 : f32 to vector<8x1xf32>
      %300 = arith.divf %298, %299 : vector<8x1xf32>
      %301 = vector.broadcast %293 : vector<8x1xf32> to vector<8x128xf32>
      %302 = arith.subf %281, %301 : vector<8x128xf32>
      %cst_198 = arith.constant 9.99999997E-7 : f32
      %303 = vector.broadcast %cst_198 : f32 to vector<8x1xf32>
      %304 = arith.addf %300, %303 : vector<8x1xf32>
      %305 = math.rsqrt %304 : vector<8x1xf32>
      %306 = vector.broadcast %305 : vector<8x1xf32> to vector<8x128xf32>
      %307 = arith.mulf %302, %306 : vector<8x128xf32>
      %308 = vector.broadcast %288 : vector<1x128xf32> to vector<8x128xf32>
      %309 = arith.mulf %307, %308 : vector<8x128xf32>
      %310 = vector.broadcast %289 : vector<1x128xf32> to vector<8x128xf32>
      %311 = arith.addf %309, %310 : vector<8x128xf32>
      %c0_199 = arith.constant 0 : index
      %c0_200 = arith.constant 0 : index
      %c0_201 = arith.constant 0 : index
      %312 = vector.load %arg23[%c0_199, %c0_200, %c0_201] : memref<1x8x128xf32, #tpu.memory_space<vmem>>, vector<1x8x128xf32>
      %313 = vector.shape_cast %312 : vector<1x8x128xf32> to vector<8x128xf32>
      %314 = vector.shape_cast %311 : vector<8x128xf32> to vector<1x8x128xf32>
      tpu.vector_store %arg23[%c0_199, %c0_200, %c0_201], %314 {strides = array<i32>} : memref<1x8x128xf32, #tpu.memory_space<vmem>>, vector<1x8x128xf32>,
    } else {
    }
    return
  }
  func.func @transform_0(%arg0: i32, %arg1: i32) -> (i32, i32, i32) {
    %c0_i32 = arith.constant 0 : i32
    %c0_i32_0 = arith.constant 0 : i32
    %c0_i32_1 = arith.constant 0 : i32
    return %arg0, %c0_i32, %c0_i32_0 : i32, i32, i32
  }
  func.func @transform_1(%arg0: i32, %arg1: i32) -> (i32, i32) {
    %c0_i32 = arith.constant 0 : i32
    %c0_i32_0 = arith.constant 0 : i32
    %c0_i32_1 = arith.constant 0 : i32
    return %c0_i32, %c0_i32_0 : i32, i32
  }
  func.func @transform_2(%arg0: i32, %arg1: i32) -> (i32, i32) {
    %c0_i32 = arith.constant 0 : i32
    %c0_i32_0 = arith.constant 0 : i32
    %c0_i32_1 = arith.constant 0 : i32
    return %c0_i32, %c0_i32_0 : i32, i32
  }
  func.func @transform_3(%arg0: i32, %arg1: i32) -> (i32, i32, i32) {
    %c0_i32 = arith.constant 0 : i32
    %c0_i32_0 = arith.constant 0 : i32
    %c0_i32_1 = arith.constant 0 : i32
    return %arg1, %c0_i32, %c0_i32_0 : i32, i32, i32
  }
  func.func @transform_4(%arg0: i32, %arg1: i32) -> (i32, i32, i32) {
    %c0_i32 = arith.constant 0 : i32
    %c0_i32_0 = arith.constant 0 : i32
    %c0_i32_1 = arith.constant 0 : i32
    return %arg1, %c0_i32, %c0_i32_0 : i32, i32, i32
  }
  func.func @transform_5(%arg0: i32, %arg1: i32) -> (i32, i32, i32, i32) {
    %c0_i32 = arith.constant 0 : i32
    %c0_i32_0 = arith.constant 0 : i32
    %c0_i32_1 = arith.constant 0 : i32
    %c0_i32_2 = arith.constant 0 : i32
    return %arg1, %c0_i32, %c0_i32_0, %c0_i32_1 : i32, i32, i32, i32
  }
  func.func @transform_6(%arg0: i32, %arg1: i32) -> (i32, i32, i32, i32) {
    %c0_i32 = arith.constant 0 : i32
    %c0_i32_0 = arith.constant 0 : i32
    %c0_i32_1 = arith.constant 0 : i32
    %c0_i32_2 = arith.constant 0 : i32
    return %arg1, %c0_i32, %c0_i32_0, %c0_i32_1 : i32, i32, i32, i32
  }
  func.func @transform_7(%arg0: i32, %arg1: i32) -> (i32, i32, i32, i32) {
    %c0_i32 = arith.constant 0 : i32
    %c0_i32_0 = arith.constant 0 : i32
    %c0_i32_1 = arith.constant 0 : i32
    %c0_i32_2 = arith.constant 0 : i32
    return %arg1, %c0_i32, %c0_i32_0, %c0_i32_1 : i32, i32, i32, i32
  }
  func.func @transform_8(%arg0: i32, %arg1: i32) -> (i32, i32, i32, i32) {
    %c0_i32 = arith.constant 0 : i32
    %c0_i32_0 = arith.constant 0 : i32
    %c0_i32_1 = arith.constant 0 : i32
    %c0_i32_2 = arith.constant 0 : i32
    return %arg1, %c0_i32, %c0_i32_0, %c0_i32_1 : i32, i32, i32, i32
  }
  func.func @transform_9(%arg0: i32, %arg1: i32) -> (i32, i32, i32, i32) {
    %c0_i32 = arith.constant 0 : i32
    %c0_i32_0 = arith.constant 0 : i32
    %c0_i32_1 = arith.constant 0 : i32
    %c0_i32_2 = arith.constant 0 : i32
    return %arg1, %c0_i32, %c0_i32_0, %c0_i32_1 : i32, i32, i32, i32
  }
  func.func @transform_10(%arg0: i32, %arg1: i32) -> (i32, i32, i32, i32) {
    %c0_i32 = arith.constant 0 : i32
    %c0_i32_0 = arith.constant 0 : i32
    %c0_i32_1 = arith.constant 0 : i32
    %c0_i32_2 = arith.constant 0 : i32
    return %arg1, %c0_i32, %c0_i32_0, %c0_i32_1 : i32, i32, i32, i32
  }
  func.func @transform_11(%arg0: i32, %arg1: i32) -> (i32, i32, i32) {
    %c0_i32 = arith.constant 0 : i32
    %c0_i32_0 = arith.constant 0 : i32
    %c0_i32_1 = arith.constant 0 : i32
    return %arg1, %c0_i32, %c0_i32_0 : i32, i32, i32
  }
  func.func @transform_12(%arg0: i32, %arg1: i32) -> (i32, i32, i32) {
    %c0_i32 = arith.constant 0 : i32
    %c0_i32_0 = arith.constant 0 : i32
    %c0_i32_1 = arith.constant 0 : i32
    return %arg1, %c0_i32, %c0_i32_0 : i32, i32, i32
  }
  func.func @transform_13(%arg0: i32, %arg1: i32) -> (i32, i32, i32) {
    %c0_i32 = arith.constant 0 : i32
    %c0_i32_0 = arith.constant 0 : i32
    %c0_i32_1 = arith.constant 0 : i32
    return %arg1, %c0_i32, %c0_i32_0 : i32, i32, i32
  }
  func.func @transform_14(%arg0: i32, %arg1: i32) -> (i32, i32, i32) {
    %c0_i32 = arith.constant 0 : i32
    %c0_i32_0 = arith.constant 0 : i32
    %c0_i32_1 = arith.constant 0 : i32
    return %arg1, %c0_i32, %c0_i32_0 : i32, i32, i32
  }
  func.func @transform_15(%arg0: i32, %arg1: i32) -> (i32, i32, i32) {
    %c0_i32 = arith.constant 0 : i32
    %c0_i32_0 = arith.constant 0 : i32
    %c0_i32_1 = arith.constant 0 : i32
    return %arg1, %c0_i32, %c0_i32_0 : i32, i32, i32
  }
  func.func @transform_16(%arg0: i32, %arg1: i32) -> (i32, i32, i32) {
    %c0_i32 = arith.constant 0 : i32
    %c0_i32_0 = arith.constant 0 : i32
    %c0_i32_1 = arith.constant 0 : i32
    return %arg1, %c0_i32, %c0_i32_0 : i32, i32, i32
  }
  func.func @transform_17(%arg0: i32, %arg1: i32) -> (i32, i32, i32) {
    %c0_i32 = arith.constant 0 : i32
    %c0_i32_0 = arith.constant 0 : i32
    %c0_i32_1 = arith.constant 0 : i32
    return %arg1, %c0_i32, %c0_i32_0 : i32, i32, i32
  }
  func.func @transform_18(%arg0: i32, %arg1: i32) -> (i32, i32, i32) {
    %c0_i32 = arith.constant 0 : i32
    %c0_i32_0 = arith.constant 0 : i32
    %c0_i32_1 = arith.constant 0 : i32
    return %arg1, %c0_i32, %c0_i32_0 : i32, i32, i32
  }
  func.func @transform_19(%arg0: i32, %arg1: i32) -> (i32, i32) {
    %c0_i32 = arith.constant 0 : i32
    %c0_i32_0 = arith.constant 0 : i32
    %c0_i32_1 = arith.constant 0 : i32
    return %c0_i32, %c0_i32_0 : i32, i32
  }
  func.func @transform_20(%arg0: i32, %arg1: i32) -> (i32, i32) {
    %c0_i32 = arith.constant 0 : i32
    %c0_i32_0 = arith.constant 0 : i32
    %c0_i32_1 = arith.constant 0 : i32
    return %c0_i32, %c0_i32_0 : i32, i32
  }
  func.func @transform_21(%arg0: i32, %arg1: i32) -> (i32, i32, i32) {
    %c0_i32 = arith.constant 0 : i32
    %c0_i32_0 = arith.constant 0 : i32
    %c0_i32_1 = arith.constant 0 : i32
    return %arg0, %c0_i32, %c0_i32_0 : i32, i32, i32
  }
}

</mosaic_0001>

<bundles_post_ra>
// kernel: tpu_custom_call.1
= control target key start
LH: loop header
LB: loop body
LE: loop exit
PB: predicated region body
PF: predicated region fallthrough
CT: control target
= control target key end

     0   :  { %s6151_s0 = inlined_call_operand.vmem [shape: f32[2,8,64], index: 0, kind: input, shape index: {}]   ;;  %s6152_s1 = inlined_call_operand.vmem [shape: bf16[64,128], index: 1, kind: input, shape index: {}]   ;;  %s6153_s2 = inlined_call_operand.vmem [shape: f32[8,128], index: 2, kind: input, shape index: {}]   ;;  %s6154_s3 = inlined_call_operand.vmem [shape: f32[2,1,128], index: 3, kind: input, shape index: {}]   ;;  %s6155_s4 = inlined_call_operand.vmem [shape: f32[2,1,128], index: 4, kind: input, shape index: {}]   ;;  %s6156_s5 = inlined_call_operand.vmem [shape: bf16[2,4,128,32], index: 5, kind: input, shape index: {}]   ;;  %s6157_s6 = inlined_call_operand.vmem [shape: f32[2,4,1,32], index: 6, kind: input, shape index: {}]   ;;  %s6158_s7 = inlined_call_operand.vmem [shape: bf16[2,4,128,32], index: 7, kind: input, shape index: {}]   ;;  %s6159_s8 = inlined_call_operand.vmem [shape: f32[2,4,1,32], index: 8, kind: input, shape index: {}]   ;;  %s6160_s9 = inlined_call_operand.vmem [shape: bf16[2,4,128,32], index: 9, kind: input, shape index: {}]   ;;  %s6161_s10 = inlined_call_operand.vmem [shape: f32[2,4,1,32], index: 10, kind: input, shape index: {}]   ;;  %s6162_s11 = inlined_call_operand.vmem [shape: bf16[2,128,128], index: 11, kind: input, shape index: {}]   ;;  %s6163_s12 = inlined_call_operand.vmem [shape: f32[2,1,128], index: 12, kind: input, shape index: {}]   ;;  %s6164_s13 = inlined_call_operand.vmem [shape: f32[2,1,128], index: 13, kind: input, shape index: {}]   ;;  %s6165_s14 = inlined_call_operand.vmem [shape: f32[2,1,128], index: 14, kind: input, shape index: {}]   ;;  %s6166_s15 = inlined_call_operand.vmem [shape: bf16[2,128,512], index: 15, kind: input, shape index: {}]   ;;  %s6167_s16 = inlined_call_operand.vmem [shape: f32[2,1,512], index: 16, kind: input, shape index: {}]   ;;  %s6168_s17 = inlined_call_operand.vmem [shape: bf16[2,512,128], index: 17, kind: input, shape index: {}]   ;;  %s6169_s18 = inlined_call_operand.vmem [shape: f32[2,1,128], index: 18, kind: input, shape index: {}]   ;;  %s6170_s19 = inlined_call_operand.vmem [shape: f32[1,128], index: 19, kind: input, shape index: {}]   ;;  %s6171_s20 = inlined_call_operand.vmem [shape: f32[1,128], index: 20, kind: input, shape index: {}]   ;;  %s6172_s21 = inlined_call_operand.hbm [shape: f32[2,8,128], index: 21, kind: output, shape index: {}]  }
   0x1   :  { %6191 = sst [smem:[#allocation20_spill]] %s6151_s0 }
   0x2   :  { %6192 = sst [smem:[#allocation21_spill]] %s6152_s1 }
   0x3   :  { %6193 = sst [smem:[#allocation22_spill]] %s6153_s2 }
   0x4   :  { %6194 = sst [smem:[#allocation23_spill]] %s6154_s3 }
   0x5   :  { %6195 = sst [smem:[#allocation24_spill]] %s6155_s4 }
   0x6   :  { %6196 = sst [smem:[#allocation25_spill]] %s6156_s5 }
   0x7   :  { %6197 = sst [smem:[#allocation26_spill]] %s6157_s6 }
   0x8   :  { %6198 = sst [smem:[#allocation27_spill]] %s6158_s7 }
   0x9   :  { %6199 = sst [smem:[#allocation28_spill]] %s6159_s8 }
   0xa   :  { %6200 = sst [smem:[#allocation29_spill]] %s6160_s9 }
   0xb   :  { %6201 = sst [smem:[#allocation30_spill]] %s6161_s10 }
   0xc   :  { %6202 = sst [smem:[#allocation31_spill]] %s6162_s11 }
   0xd   :  { %6203 = sst [smem:[#allocation32_spill]] %s6164_s13 }
   0xe   :  { %6204 = sst [smem:[#allocation33_spill]] %s6167_s16 }
   0xf   :  { %6205 = sst [smem:[#allocation34_spill]] %s6168_s17 }
  0x10   :  { %6206 = sst [smem:[#allocation35_spill]] %s6169_s18 }
  0x11   :  { %6207 = sst [smem:[#allocation36_spill]] %s6170_s19 }
  0x12   :  { %6208 = sst [smem:[#allocation37_spill]] %s6171_s20 }
  0x13   :  { %6209 = sst [smem:[#allocation38_spill]] %s6172_s21 }
  0x14   :  { %26 = vsyncpa [#allocation3], 0 }
  0x15   :  { %28 = vsyncpa [#allocation3 + $0x1], 0  ;;  %s5449_s2 = smov 0   ;;  %s5451_s25 = smov 0  }
  0x16   :  { %s5453_s26 = smov 0   ;;  %s5455_s27 = smov 0  }
  0x17   :  { %s5457_s3 = smov 0   ;;  %s5459_s28 = smov 0  }
  0x18   :  { %s5461_s29 = smov 0   ;;  %s5463_s0 = smov 0  }
  0x19 LB: > { %6210 = sst [smem:[#allocation5_spill]] %s5299_s2  ;;  %s4037_s4 = sadd.s32 4294967295, %s5327_s0   ;;  %s5327_s0 = sphi %s5463_s0, %s34_s0   ;;  %s5323_s29 = sphi %s5461_s29, %s6273_s29   ;;  %s5319_s28 = sphi %s5459_s28, %s6272_s28   ;;  %s5315_s3 = sphi %s5457_s3, %s6271_s3   ;;  %s5311_s27 = sphi %s5455_s27, %s6270_s27   ;;  %s5307_s26 = sphi %s5453_s26, %s6269_s26   ;;  %s5303_s25 = sphi %s5451_s25, %s6268_s25   ;;  %s5299_s2 = sphi %s5449_s2, %s6267_s2  }
  0x1a   : > { %6211 = sst [smem:[#allocation6_spill]] %s5303_s25  ;;  %s4038_s30 = sadd.s32 4294967294, %s5327_s0  }
  0x1b   : > { %6212 = sst [smem:[#allocation7_spill]] %s5307_s26  ;;  %s43_s5 = sadd.s32 1, %s5319_s28 }
  0x1c   : > { %6213 = sst [smem:[#allocation8_spill]] %s5311_s27  ;;  %p44_p0 = scmp.ge.s32.totalorder %s43_s5, 2 }
  0x1d   : > { %6214 = sst [smem:[#allocation9_spill]] %s5315_s3  ;;  %s46_s22 = sadd.s32 1, %s5323_s29 }
  0x1e   : > { %6215 = sst [smem:[#allocation10_spill]] %s5319_s28  ;;  %p589_p1 = scmp.ne.s32.totalorder %s5307_s26, %s5303_s25 }
  0x1f   : > { %6216 = sst [smem:[#allocation11_spill]] %s5323_s29  ;;  %p590_p2 = scmp.eq.s32.totalorder %s4037_s4, 3 }
  0x20   : > { %6217 = sst [smem:[#allocation12_spill]] %s5327_s0  ;;  %s6275_s5 = smov (%p44_p0, %s43_s5), 0 }
  0x21   : > { %6218 = sst [smem:[#allocation13_spill]] %s6275_s5  ;;  %s6277_s22 = smov (!%p44_p0, %s46_s22), %s5323_s29 }
  0x22   : > { %p5498_p3 = por %p590_p2, %p589_p1  ;;  %p595_p4 = scmp.ne.s32.totalorder %s5303_s25, %s5299_s2 }
  0x23   : > { %p48_p5 = scmp.ge.s32.totalorder %s6277_s22, 2  ;;  %p596_p6 = scmp.eq.s32.totalorder %s4038_s30, 3 }
  0x24   : > { %s6219_s23 = scalar_select %p5498_p3, 1, 0 }
  0x25   : > { %p4041_p7 = scmp.ge.s32.totalorder %s5327_s0, 1  ;;  %p745_p8 = scmp.lt.s32.totalorder %s5327_s0, 5 }
  0x26   : > { %6220 = sst [smem:[#allocation14_spill]] %s6219_s23  ;;  %s6279_s22 = smov (%p48_p5, %s6277_s22), 0 }
  0x27   : > { %6221 = sst [smem:[#allocation15_spill]] %s6279_s22  ;;  %p5508_p9 = por %p596_p6, %p595_p4 }
  0x28   : > { %p746_p10 = pnand %p4041_p7, %p745_p8  ;;  %s576_s24 = ssub.s32 %s5323_s29, %s6279_s22 }
  0x29   : > { %s6222_s1 = scalar_select %p5508_p9, 1, 0 }
  0x2a   : > { %s579_s4 = sadd.s32 1, %s5307_s26  ;;  %p577_p11 = scmp.eq.s32.totalorder %s576_s24, 0 }
  0x2b   : > { %6223 = sst [smem:[#allocation16_spill]] %s6222_s1  ;;  %749 = sbr.rel (%p746_p10) target bundleno = 5143 (0x1417), region = 104 }
  0x2c   : > { %s5516_s5 = scalar_select %p577_p11, %s5307_s26, %s579_s4  }
  0x2e   : > { %6224 = sst [smem:[#allocation17_spill]] %s5516_s5 }
  0x30   : > { %s6180_s30 = sand.u32 1, %s5303_s25   ;;  %p868_p12 = scmp.lt.s32.totalorder %s5315_s3, 1 }
  0x31   : > { %s4042_s28 = sshll.u32 %s6180_s30, 3  ;;  %p872_p13 = scmp.lt.s32.totalorder %s5311_s27, 1 }
  0x32   : > { %s869_s2 = scalar_select %p868_p12, %s5315_s3, 1 }
  0x33   : > { %s5525_s1 = scalar_select %p872_p13, %s5311_s27, 1 }
  0x34   : > { %s4043_s24 = sshll.u32 %s869_s2, 3  ;;  %s6225_s29 = sld [smem:[#allocation20_spill]] }
  0x35   : > { %s4420_s19 = sshll.u32 %s5525_s1, 8  ;;  %s6228_s17 = sld [smem:[#allocation25_spill]] }
  0x36   : > { %s5547_s16 = sshll.u32 %s5525_s1, 2  ;;  %s6229_s6 = sld [smem:[#allocation26_spill]] }
  0x37   : > { %s6230_s7 = sld [smem:[#allocation27_spill]]  ;;  %s4423_s20 = sshll.u32 %s5525_s1, 6 }
  0x38   : > { %s6231_s8 = sld [smem:[#allocation28_spill]] }
  0x39   : > { %s6232_s9 = sld [smem:[#allocation29_spill]] }
  0x3a   : > { %s5530_s5 = scalar_lea.vmem %s6225_s29, %s4043_s24  ;;  %s6233_s10 = sld [smem:[#allocation30_spill]] }
  0x3b   : > { %s5544_s2 = scalar_lea.vmem %s6228_s17, %s4420_s19  ;;  %s6235_s11 = sld [smem:[#allocation31_spill]] }
  0x3c   : > { %s5553_s26 = scalar_lea.vmem %s6229_s6, %s5547_s16  ;;  %s6238_s25 = sld [smem:[#allocation33_spill]] }
  0x3d   : > { %s5558_s0 = scalar_lea.vmem %s6230_s7, %s4420_s19  ;;  %s6239_s18 = sld [smem:[#allocation34_spill]] }
  0x3e   : > { %s5564_s17 = scalar_lea.vmem %s6231_s8, %s5547_s16  ;;  %s6240_s23 = sld [smem:[#allocation35_spill]] }
  0x3f   : > { %s5569_s24 = scalar_lea.vmem %s6232_s9, %s4420_s19  ;;  %s5613_s9 = scalar_lea.vmem [#allocation2], %s4042_s28 }
  0x40   : > { %s5575_s22 = scalar_lea.vmem %s6233_s10, %s5547_s16  ;;  %s6241_s30 = sld [smem:[#allocation8_spill]] }
  0x41   : > { %6234 = sst [smem:[#allocation18_spill]] %s5575_s22  ;;  %s5581_s3 = scalar_lea.vmem %s6235_s11, %s4423_s20 }
  0x42   : > { %6236 = sst [smem:[#allocation19_spill]] %s5581_s3  ;;  %s5598_s22 = scalar_lea.vmem %s6166_s15, %s4420_s19 }
  0x43   : > { %s927_s11 = scalar_lea.vmem %s6238_s25, %s5547_s16  ;;  %s5607_s27 = scalar_lea.vmem %s6239_s18, %s4420_s19 }
  0x44   : > { %s935_s13 = scalar_lea.vmem %s6240_s23, %s5525_s1 }
  0x46   : > { %p4060_p0 = scmp.ne.s32.totalorder %s6241_s30, 0 }
  0x47   : > { %s6242_s4 = sld [smem:[#allocation21_spill]] (!%p4060_p0) }
  0x48   : > { %940 = sbr.rel (%p4060_p0) target bundleno = 293 (0x125), region = 108  ;;  %s6243_s18 = sld [smem:[#allocation22_spill]] (!%p4060_p0) }
  0x4d   : > { %v5008_v0 = vld [vmem:[%s6242_s4 + $0x18] sm:$0xff]   ;;  %v5329_v1 = vmov 0.0   ;;  %v5009_v2 = vld [vmem:[%s6242_s4 + $0x10] sm:$0xff]   ;;  %vm5330_vm0 = vmmov 0   ;;  %v5010_v3 = vld [vmem:[%s6242_s4 + $0x8] sm:$0xff]   ;;  %vm976_vm1 = vcmask 523264  }
  0x4e   : > { %4608 = vmatprep.subr.bf16.mxu0 %v5329_v1  ;;  %4616 = vmatprep.mubr.msk.bf16.mxu0 %vm5330_vm0, %v5329_v1  ;;  %v5011_v4 = vld [vmem:[%s6242_s4] sm:$0xff]  }
  0x4f   : > { %4609 = vmatpush3.bf16.msra.mxu0 %v5008_v0  ;;  %v941_v5 = vld [vmem:[%s5530_s5] sm:$0xff] }
  0x50   : > { %4610 = vmatprep.subr.bf16.mxu0 %v5329_v1  ;;  %v942_v6 = vpack.c.bf16 %v941_v5, %v941_v5  ;;  %v951_v7 = vld [vmem:[%s6243_s18] sm:$0xff] }
  0x53   : > { %4611 = vmatpush3.bf16.msra.mxu0 %v5009_v2 }
  0x54   : > { %4612 = vmatprep.subr.bf16.mxu0 %v5329_v1 }
  0x57   : > { %4613 = vmatpush3.bf16.msra.mxu0 %v5010_v3 }
  0x58   : > { %4614 = vmatprep.subr.bf16.mxu0 %v5329_v1 }
  0x5b   : > { %4615 = vmatpush3.bf16.msra.mxu0 %v5011_v4 }
  0x5e   : > { %4617 = vmatmul.mubr.msk.bf16.vlgmr.msra.gmra.mxu0 %vm976_vm1, %v942_v6 }
 0x11e   : > { %v1014_v8 = vpop.f32.mrf.mxu0 }
 0x11f   : > { %v1015_v9 = vadd.f32 %v1014_v8, %v951_v7 }
 0x120   : > { %v4618_v10 = vpop.f32.mrf.mxu0 }
 0x121   : > { %1020 = vst [vmem:[%s5613_s9] sm:$0xff] %v1015_v9 }
 0x122   : > { %v1017_v11 = vpop.f32.mrf.mxu0 }
 0x124   : > { %v4619_v12 = vpop.f32.mrf.mxu0 }
 0x125 PF: > { %v5012_v14 = vld [vmem:[%s5544_s2 + $0x38] sm:$0xff]   ;;  %v5331_v16 = vmov 0.0   ;;  %v5014_v17 = vld [vmem:[%s5544_s2 + $0x30] sm:$0xff]   ;;  %v5016_v23 = vld [vmem:[%s5544_s2 + $0x28] sm:$0xff]   ;;  %vm5332_vm2 = vmmov 0   ;;  %s6244_s8 = sld [smem:[#allocation23_spill]]  ;;  %s6250_s21 = scalar_lea.vmem %s6163_s12, %s5525_s1 }
 0x126   : > { %v5013_v15 = vld [vmem:[%s5558_s0 + $0x38] sm:$0xff]   ;;  %4620 = vmatprep.subr.bf16.mxu0 %v5331_v16  ;;  %4640 = vmatprep.subr.bf16.mxu1 %v5331_v16  ;;  %v5015_v18 = vld [vmem:[%s5558_s0 + $0x30] sm:$0xff]   ;;  %v5017_v24 = vld [vmem:[%s5558_s0 + $0x28] sm:$0xff]   ;;  %s6246_s3 = sld [smem:[#allocation24_spill]]  ;;  %vm1386_vm3 = vcmask 261120   ;;  %vm1451_vm4 = vcmask 1043456   ;;  %s6253_s7 = scalar_lea.vmem %s6165_s14, %s5525_s1 }
 0x127   : > { %4621 = vmatpush3.bf16.msra.mxu0 %v5012_v14  ;;  %4641 = vmatpush3.bf16.msra.mxu1 %v5013_v15  ;;  %v5018_v25 = vld [vmem:[%s5544_s2 + $0x20] sm:$0xff]   ;;  %v5020_v27 = vld [vmem:[%s5544_s2 + $0x18] sm:$0xff]   ;;  %v5022_v29 = vld [vmem:[%s5544_s2 + $0x10] sm:$0xff]   ;;  %s6248_s28 = sld [smem:[#allocation18_spill]]  ;;  %vm1434_vm5 = vcmask 64512   ;;  %vm2849_vm6 = vcmask 523264  }
 0x128   : > { %v1021_v13 = vld [vmem:[%s5613_s9] sm:$0xff]  ;;  %4622 = vmatprep.subr.bf16.mxu0 %v5331_v16  ;;  %4642 = vmatprep.subr.bf16.mxu1 %v5331_v16  ;;  %v5021_v28 = vld [vmem:[%s5558_s0 + $0x18] sm:$0xff]   ;;  %v5023_v30 = vld [vmem:[%s5558_s0 + $0x10] sm:$0xff]   ;;  %vm2851_vm7 = vcmask 785408   ;;  %s6251_s6 = sld [smem:[#allocation32_spill]] }
 0x129   : > { %1024 = vadd.xlane.f32.xlu0 %v1021_v13  ;;  %v5019_v26 = vld [vmem:[%s5558_s0 + $0x20] sm:$0xff]   ;;  %v5024_v31 = vld [vmem:[%s5544_s2 + $0x8] sm:$0xff]   ;;  %4636 = vmatprep.mubr.msk.bf16.mxu0 %vm5332_vm2, %v5331_v16  ;;  %v5028_v44 = vld [vmem:[%s5569_s24 + $0x38] sm:$0xff]   ;;  %s6256_s29 = sld [smem:[#allocation8_spill]] }
 0x12a   : > { %v5025_v32 = vld [vmem:[%s5558_s0 + $0x8] sm:$0xff]   ;;  %v5026_v33 = vld [vmem:[%s5544_s2] sm:$0xff]   ;;  %4656 = vmatprep.mubr.msk.bf16.mxu1 %vm5332_vm2, %v5331_v16  ;;  %v5029_v46 = vld [vmem:[%s5569_s24 + $0x30] sm:$0xff]  }
 0x12b   : > { %4623 = vmatpush3.bf16.msra.mxu0 %v5014_v17  ;;  %4643 = vmatpush3.bf16.msra.mxu1 %v5015_v18  ;;  %v5027_v34 = vld [vmem:[%s5558_s0] sm:$0xff]   ;;  %s6245_s30 = scalar_lea.vmem %s6244_s8, %s5525_s1  ;;  %v5030_v47 = vld [vmem:[%s5569_s24 + $0x28] sm:$0xff]   ;;  %v5032_v49 = vld [vmem:[%s5569_s24 + $0x18] sm:$0xff]  }
 0x12c   : > { %4624 = vmatprep.subr.bf16.mxu0 %v5331_v16  ;;  %4644 = vmatprep.subr.bf16.mxu1 %v5331_v16  ;;  %v4066_v39 = vld [vmem:[%s6245_s30] ss:$0 sm:$0xff]  ;;  %s6247_s19 = scalar_lea.vmem %s6246_s3, %s5525_s1  ;;  %v5033_v50 = vld [vmem:[%s5569_s24 + $0x10] sm:$0xff]   ;;  %v5034_v51 = vld [vmem:[%s5569_s24 + $0x8] sm:$0xff]  }
 0x12d   : > { %v4067_v41 = vld [vmem:[%s6247_s19] ss:$0 sm:$0xff]  ;;  %v5036_v53 = vld [vmem:[%s5558_s0 + $0x78] sm:$0xff]   ;;  %v5037_v54 = vld [vmem:[%s5558_s0 + $0x70] sm:$0xff]  }
 0x12e   : > { %v5031_v48 = vld [vmem:[%s5569_s24 + $0x20] sm:$0xff]   ;;  %v5038_v55 = vld [vmem:[%s5558_s0 + $0x68] sm:$0xff]   ;;  %v5040_v57 = vld [vmem:[%s5558_s0 + $0x58] sm:$0xff]   ;;  %s6252_s18 = scalar_lea.vmem %s6251_s6, %s5525_s1 }
 0x12f   : > { %4625 = vmatpush3.bf16.msra.mxu0 %v5016_v23  ;;  %4645 = vmatpush3.bf16.msra.mxu1 %v5017_v24  ;;  %v5035_v52 = vld [vmem:[%s5569_s24] sm:$0xff]   ;;  %v5041_v58 = vld [vmem:[%s5558_s0 + $0x50] sm:$0xff]   ;;  %v5042_v59 = vld [vmem:[%s5558_s0 + $0x48] sm:$0xff]   ;;  %p4413_p1 = scmp.ne.s32.totalorder %s6256_s29, 1 }
 0x130   : > { %4626 = vmatprep.subr.bf16.mxu0 %v5331_v16  ;;  %4646 = vmatprep.subr.bf16.mxu1 %v5331_v16  ;;  %v5039_v56 = vld [vmem:[%s5558_s0 + $0x60] sm:$0xff]   ;;  %v5044_v61 = vld [vmem:[%s5544_s2 + $0xb8] sm:$0xff]   ;;  %v5045_v62 = vld [vmem:[%s5544_s2 + $0xb0] sm:$0xff]   ;;  %s6257_s3 = sld [smem:[#allocation36_spill]] (!%p4413_p1) }
 0x131   : > { %v5043_v60 = vld [vmem:[%s5558_s0 + $0x40] sm:$0xff]   ;;  %v5046_v63 = vld [vmem:[%s5544_s2 + $0xa8] sm:$0xff]   ;;  %v5048_v1 = vld [vmem:[%s5544_s2 + $0x98] sm:$0xff]  }
 0x132   : > { %v5047_v0 = vld [vmem:[%s5544_s2 + $0xa0] sm:$0xff]   ;;  %v5049_v2 = vld [vmem:[%s5544_s2 + $0x90] sm:$0xff]   ;;  %v5050_v3 = vld [vmem:[%s5544_s2 + $0x88] sm:$0xff]  }
 0x133   : > { %4627 = vmatpush3.bf16.msra.mxu0 %v5018_v25  ;;  %4647 = vmatpush3.bf16.msra.mxu1 %v5019_v26  ;;  %v5051_v4 = vld [vmem:[%s5544_s2 + $0x80] sm:$0xff]   ;;  %v5052_v5 = vld [vmem:[%s5569_s24 + $0xb8] sm:$0xff]   ;;  %v5053_v6 = vld [vmem:[%s5569_s24 + $0xb0] sm:$0xff]  }
 0x134   : > { %4628 = vmatprep.subr.bf16.mxu0 %v5331_v16  ;;  %4648 = vmatprep.subr.bf16.mxu1 %v5331_v16  ;;  %v5054_v7 = vld [vmem:[%s5569_s24 + $0xa8] sm:$0xff]   ;;  %v5055_v8 = vld [vmem:[%s5569_s24 + $0xa0] sm:$0xff]   ;;  %v5056_v9 = vld [vmem:[%s5569_s24 + $0x98] sm:$0xff]  }
 0x135   : > { %v5057_v10 = vld [vmem:[%s5569_s24 + $0x90] sm:$0xff]   ;;  %v5058_v11 = vld [vmem:[%s5569_s24 + $0x88] sm:$0xff]   ;;  %v5059_v12 = vld [vmem:[%s5569_s24 + $0x80] sm:$0xff]  }
 0x136   : > { %v5061_v14 = vld [vmem:[%s5558_s0 + $0xf0] sm:$0xff]   ;;  %v5062_v15 = vld [vmem:[%s5558_s0 + $0xe8] sm:$0xff]   ;;  %v5063_v17 = vld [vmem:[%s5558_s0 + $0xe0] sm:$0xff]  }
 0x137   : > { %4629 = vmatpush3.bf16.msra.mxu0 %v5020_v27  ;;  %4649 = vmatpush3.bf16.msra.mxu1 %v5021_v28  ;;  %v5064_v18 = vld [vmem:[%s5558_s0 + $0xd8] sm:$0xff]  }
 0x138   : > { %4630 = vmatprep.subr.bf16.mxu0 %v5331_v16  ;;  %4650 = vmatprep.subr.bf16.mxu1 %v5331_v16 }
 0x13b   : > { %4631 = vmatpush3.bf16.msra.mxu0 %v5022_v29  ;;  %4651 = vmatpush3.bf16.msra.mxu1 %v5023_v30  ;;  %v4068_v29 = vld [vmem:[%s5553_s26] ss:$0 sm:$0xff] }
 0x13c   : > { %4632 = vmatprep.subr.bf16.mxu0 %v5331_v16  ;;  %4652 = vmatprep.subr.bf16.mxu1 %v5331_v16 }
 0x13f   : > { %4633 = vmatpush3.bf16.msra.mxu0 %v5024_v31  ;;  %4653 = vmatpush3.bf16.msra.mxu1 %v5025_v32 }
 0x140   : > { %4634 = vmatprep.subr.bf16.mxu0 %v5331_v16  ;;  %4654 = vmatprep.subr.bf16.mxu1 %v5331_v16 }
 0x143   : > { %4635 = vmatpush3.bf16.msra.mxu0 %v5026_v33  ;;  %4655 = vmatpush3.bf16.msra.mxu1 %v5027_v34 }
 0x144   : > { %4660 = vmatprep.subr.bf16.mxu0 %v5331_v16  ;;  %4680 = vmatprep.subr.bf16.mxu1 %v5331_v16 }
 0x1b2   : > { %v1025_v19 = vpop.xlane.xlu0 %1024 }
 0x1b3   : > { %v1027_v20 = vmul.f32 0.0078125, %v1025_v19  ;;  %v5065_v19 = vld [vmem:[%s5558_s0 + $0xd0] sm:$0xff]  }
 0x1b5   : > { %v1028_v21 = vsub.f32 %v1021_v13, %v1027_v20  ;;  %v5060_v13 = vld [vmem:[%s5558_s0 + $0xf8] sm:$0xff]   ;;  %v5066_v20 = vld [vmem:[%s5558_s0 + $0xc8] sm:$0xff]  }
 0x1b7   : > { %v1029_v22 = vmul.f32 %v1028_v21, %v1028_v21 }
 0x1b9   : > { %1030 = vadd.xlane.f32.xlu0 %v1029_v22  ;;  %v4077_v22 = vld [vmem:[%s5564_s17] ss:$0 sm:$0xff] }
 0x242   : > { %v1031_v35 = vpop.xlane.xlu0 %1030 }
 0x243   : > { %v1032_v36 = vmul.f32 0.0078125, %v1031_v35 }
 0x245   : > { %v1033_v37 = vadd.f32 1e-06, %v1032_v36 }
 0x247   : > { %5196 = vrsqrt.f32 %v1033_v37  ;;  %v4086_v37 = vld [vmem:[%s6248_s28] ss:$0 sm:$0xff] }
 0x254   : > { %v5197_v38 = vpop.eup %5196 }
 0x255   : > { %v1035_v40 = vmul.f32 %v5197_v38, %v1028_v21  ;;  %v5067_v21 = vld [vmem:[%s5558_s0 + $0xc0] sm:$0xff]  }
 0x257   : > { %v1042_v42 = vmul.f32 %v4066_v39, %v1035_v40 }
 0x259   : > { %v1049_v43 = vadd.f32 %v4067_v41, %v1042_v42 }
 0x25b   : > { %v5683_v45 = vpack.c.bf16 %v1049_v43, %v1049_v43 }
 0x25d   : > { %4637 = vmatmul.mubr.bf16.vlgmr.msra.gmra.mxu0 %v5683_v45  ;;  %4657 = vmatmul.mubr.bf16.vlgmr.msra.gmra.mxu1 %v5683_v45 }
 0x25e   : > { %4661 = vmatpush3.bf16.msra.mxu0 %v5028_v44  ;;  %4676 = vmatprep.mubr.msk.bf16.mxu0 %vm5332_vm2, %v5331_v16 }
 0x25f   : > { %4662 = vmatprep.subr.bf16.mxu0 %v5331_v16  ;;  %4682 = vmatprep.mubr.msk.bf16.mxu1 %vm5332_vm2, %v5331_v16 }
 0x262   : > { %4663 = vmatpush3.bf16.msra.mxu0 %v5029_v46 }
 0x263   : > { %4664 = vmatprep.subr.bf16.mxu0 %v5331_v16 }
 0x266   : > { %4665 = vmatpush3.bf16.msra.mxu0 %v5030_v47 }
 0x267   : > { %4666 = vmatprep.subr.bf16.mxu0 %v5331_v16 }
 0x26a   : > { %4667 = vmatpush3.bf16.msra.mxu0 %v5031_v48 }
 0x26b   : > { %4668 = vmatprep.subr.bf16.mxu0 %v5331_v16 }
 0x26e   : > { %4669 = vmatpush3.bf16.msra.mxu0 %v5032_v49 }
 0x26f   : > { %4670 = vmatprep.subr.bf16.mxu0 %v5331_v16 }
 0x272   : > { %4671 = vmatpush3.bf16.msra.mxu0 %v5033_v50 }
 0x273   : > { %4672 = vmatprep.subr.bf16.mxu0 %v5331_v16 }
 0x276   : > { %4673 = vmatpush3.bf16.msra.mxu0 %v5034_v51 }
 0x277   : > { %4674 = vmatprep.subr.bf16.mxu0 %v5331_v16 }
 0x27a   : > { %4675 = vmatpush3.bf16.msra.mxu0 %v5035_v52 }
 0x27b   : > { %4712 = vmatprep.subr.bf16.mxu0 %v5331_v16 }
 0x27d   : > { %4677 = vmatmul.mubr.bf16.vlgmr.msra.gmra.mxu0 %v5683_v45 }
 0x27e   : > { %4713 = vmatpush3.bf16.msra.mxu0 %v5036_v53  ;;  %4728 = vmatprep.mubr.msk.bf16.mxu0 %vm5332_vm2, %v5331_v16 }
 0x27f   : > { %4714 = vmatprep.subr.bf16.mxu0 %v5331_v16 }
 0x282   : > { %4715 = vmatpush3.bf16.msra.mxu0 %v5037_v54 }
 0x283   : > { %4716 = vmatprep.subr.bf16.mxu0 %v5331_v16 }
 0x286   : > { %4717 = vmatpush3.bf16.msra.mxu0 %v5038_v55 }
 0x287   : > { %4718 = vmatprep.subr.bf16.mxu0 %v5331_v16 }
 0x28a   : > { %4719 = vmatpush3.bf16.msra.mxu0 %v5039_v56 }
 0x28b   : > { %4720 = vmatprep.subr.bf16.mxu0 %v5331_v16 }
 0x28e   : > { %4721 = vmatpush3.bf16.msra.mxu0 %v5040_v57 }
 0x28f   : > { %4722 = vmatprep.subr.bf16.mxu0 %v5331_v16 }
 0x292   : > { %4723 = vmatpush3.bf16.msra.mxu0 %v5041_v58  ;;  %v4300_v58 = vld [vmem:[%s5564_s17 + $0x3] ss:$0 sm:$0xff] }
 0x293   : > { %4724 = vmatprep.subr.bf16.mxu0 %v5331_v16 }
 0x296   : > { %4725 = vmatpush3.bf16.msra.mxu0 %v5042_v59 }
 0x297   : > { %4726 = vmatprep.subr.bf16.mxu0 %v5331_v16 }
 0x29a   : > { %4727 = vmatpush3.bf16.msra.mxu0 %v5043_v60 }
 0x29b   : > { %4764 = vmatprep.subr.bf16.mxu0 %v5331_v16 }
 0x29d   : > { %4729 = vmatmul.mubr.bf16.vlgmr.msra.gmra.mxu0 %v5683_v45 }
 0x29e   : > { %4765 = vmatpush3.bf16.msra.mxu0 %v5044_v61  ;;  %4780 = vmatprep.mubr.msk.bf16.mxu0 %vm5332_vm2, %v5331_v16 }
 0x29f   : > { %4766 = vmatprep.subr.bf16.mxu0 %v5331_v16 }
 0x2a2   : > { %4767 = vmatpush3.bf16.msra.mxu0 %v5045_v62 }
 0x2a3   : > { %4768 = vmatprep.subr.bf16.mxu0 %v5331_v16 }
 0x2a6   : > { %4769 = vmatpush3.bf16.msra.mxu0 %v5046_v63 }
 0x2a7   : > { %4770 = vmatprep.subr.bf16.mxu0 %v5331_v16 }
 0x2aa   : > { %4771 = vmatpush3.bf16.msra.mxu0 %v5047_v0 }
 0x2ab   : > { %4772 = vmatprep.subr.bf16.mxu0 %v5331_v16 }
 0x2ae   : > { %4773 = vmatpush3.bf16.msra.mxu0 %v5048_v1 }
 0x2af   : > { %4774 = vmatprep.subr.bf16.mxu0 %v5331_v16 }
 0x2b2   : > { %4775 = vmatpush3.bf16.msra.mxu0 %v5049_v2 }
 0x2b3   : > { %4776 = vmatprep.subr.bf16.mxu0 %v5331_v16 }
 0x2b6   : > { %4777 = vmatpush3.bf16.msra.mxu0 %v5050_v3 }
 0x2b7   : > { %4778 = vmatprep.subr.bf16.mxu0 %v5331_v16 }
 0x2ba   : > { %4779 = vmatpush3.bf16.msra.mxu0 %v5051_v4 }
 0x2bb   : > { %4804 = vmatprep.subr.bf16.mxu0 %v5331_v16 }
 0x2bd   : > { %4781 = vmatmul.mubr.bf16.vlgmr.msra.gmra.mxu0 %v5683_v45 }
 0x2be   : > { %4805 = vmatpush3.bf16.msra.mxu0 %v5052_v5  ;;  %4820 = vmatprep.mubr.msk.bf16.mxu0 %vm5332_vm2, %v5331_v16 }
 0x2bf   : > { %4806 = vmatprep.subr.bf16.mxu0 %v5331_v16 }
 0x2c2   : > { %4807 = vmatpush3.bf16.msra.mxu0 %v5053_v6 }
 0x2c3   : > { %4808 = vmatprep.subr.bf16.mxu0 %v5331_v16 }
 0x2c6   : > { %4809 = vmatpush3.bf16.msra.mxu0 %v5054_v7 }
 0x2c7   : > { %4810 = vmatprep.subr.bf16.mxu0 %v5331_v16 }
 0x2ca   : > { %4811 = vmatpush3.bf16.msra.mxu0 %v5055_v8 }
 0x2cb   : > { %4812 = vmatprep.subr.bf16.mxu0 %v5331_v16 }
 0x2ce   : > { %4813 = vmatpush3.bf16.msra.mxu0 %v5056_v9 }
 0x2cf   : > { %4814 = vmatprep.subr.bf16.mxu0 %v5331_v16 }
 0x2d2   : > { %4815 = vmatpush3.bf16.msra.mxu0 %v5057_v10 }
 0x2d3   : > { %4816 = vmatprep.subr.bf16.mxu0 %v5331_v16 }
 0x2d6   : > { %4817 = vmatpush3.bf16.msra.mxu0 %v5058_v11 }
 0x2d7   : > { %4818 = vmatprep.subr.bf16.mxu0 %v5331_v16 }
 0x2da   : > { %4819 = vmatpush3.bf16.msra.mxu0 %v5059_v12 }
 0x2db   : > { %4856 = vmatprep.subr.bf16.mxu0 %v5331_v16 }
 0x2dd   : > { %4821 = vmatmul.mubr.bf16.vlgmr.msra.gmra.mxu0 %v5683_v45 }
 0x2de   : > { %4857 = vmatpush3.bf16.msra.mxu0 %v5060_v13  ;;  %4872 = vmatprep.mubr.msk.bf16.mxu0 %vm5332_vm2, %v5331_v16 }
 0x2df   : > { %4858 = vmatprep.subr.bf16.mxu0 %v5331_v16 }
 0x2e2   : > { %4859 = vmatpush3.bf16.msra.mxu0 %v5061_v14 }
 0x2e3   : > { %4860 = vmatprep.subr.bf16.mxu0 %v5331_v16 }
 0x2e6   : > { %4861 = vmatpush3.bf16.msra.mxu0 %v5062_v15 }
 0x2e7   : > { %4862 = vmatprep.subr.bf16.mxu0 %v5331_v16 }
 0x2ea   : > { %4863 = vmatpush3.bf16.msra.mxu0 %v5063_v17  ;;  %v5068_v17 = vld [vmem:[%s5544_s2 + $0x78] sm:$0xff]  }
 0x2eb   : > { %4864 = vmatprep.subr.bf16.mxu0 %v5331_v16 }
 0x2ee   : > { %4865 = vmatpush3.bf16.msra.mxu0 %v5064_v18 }
 0x2ef   : > { %4866 = vmatprep.subr.bf16.mxu0 %v5331_v16 }
 0x2f2   : > { %4867 = vmatpush3.bf16.msra.mxu0 %v5065_v19  ;;  %v5069_v19 = vld [vmem:[%s5544_s2 + $0x70] sm:$0xff]  }
 0x2f3   : > { %4868 = vmatprep.subr.bf16.mxu0 %v5331_v16 }
 0x2f6   : > { %4869 = vmatpush3.bf16.msra.mxu0 %v5066_v20  ;;  %v5070_v20 = vld [vmem:[%s5544_s2 + $0x68] sm:$0xff]  }
 0x2f7   : > { %4870 = vmatprep.subr.bf16.mxu0 %v5331_v16 }
 0x2fa   : > { %4871 = vmatpush3.bf16.msra.mxu0 %v5067_v21  ;;  %v5071_v21 = vld [vmem:[%s5544_s2 + $0x60] sm:$0xff]  }
 0x2fb   : > { %4896 = vmatprep.subr.bf16.mxu0 %v5331_v16 }
 0x2fd   : > { %4873 = vmatmul.mubr.bf16.vlgmr.msra.gmra.mxu0 %v5683_v45 }
 0x2fe   : > { %4898 = vmatprep.mubr.msk.bf16.mxu0 %vm5332_vm2, %v5331_v16 }
 0x31d   : > { %v1156_v23 = vpop.f32.mrf.mxu0  ;;  %v1267_v24 = vpop.f32.mrf.mxu1 }
 0x31e   : > { %v1268_v25 = vadd.f32 %v4077_v22, %v1267_v24  ;;  %v1157_v35 = vadd.f32 %v4068_v29, %v1156_v23  ;;  %v5072_v22 = vld [vmem:[%s5544_s2 + $0x58] sm:$0xff]   ;;  %v5073_v23 = vld [vmem:[%s5544_s2 + $0x50] sm:$0xff]   ;;  %v5074_v24 = vld [vmem:[%s5544_s2 + $0x48] sm:$0xff]  }
 0x31f   : > { %v4638_v26 = vpop.f32.mrf.mxu0  ;;  %v4658_v27 = vpop.f32.mrf.mxu1  ;;  %v5079_v29 = vld [vmem:[%s5569_s24 + $0x60] sm:$0xff]  }
 0x320   : > { %v1385_v28 = vpack.c.bf16 %v1268_v25, %v1268_v25  ;;  %v1384_v36 = vpack.c.bf16 %v1157_v35, %v1157_v35  ;;  %v5075_v25 = vld [vmem:[%s5544_s2 + $0x40] sm:$0xff]   ;;  %v5076_v26 = vld [vmem:[%s5569_s24 + $0x78] sm:$0xff]   ;;  %v5077_v27 = vld [vmem:[%s5569_s24 + $0x70] sm:$0xff]  }
 0x321   : > { %v1159_v30 = vpop.f32.mrf.mxu0  ;;  %v1270_v31 = vpop.f32.mrf.mxu1  ;;  %v5083_v35 = vld [vmem:[%s5569_s24 + $0x40] sm:$0xff]  }
 0x322   : > { %v1391_v32 = vsel %vm1386_vm3, %v1385_v28, 0  ;;  %v5078_v28 = vld [vmem:[%s5569_s24 + $0x68] sm:$0xff]   ;;  %v5080_v30 = vld [vmem:[%s5569_s24 + $0x58] sm:$0xff]   ;;  %v5081_v31 = vld [vmem:[%s5569_s24 + $0x50] sm:$0xff]  }
 0x323   : > { %v4639_v33 = vpop.f32.mrf.mxu0  ;;  %v4659_v34 = vpop.f32.mrf.mxu1  ;;  %4681 = vmatpush3.bf16.xpose.msra.mxu1 %v1391_v32  ;;  %v4140_v32 = vld [vmem:[%s5564_s17 + $0x1] ss:$0 sm:$0xff] }
 0x324   : > { %4686 = vmatprep.subr.bf16.mxu1 %v5331_v16  ;;  %v5082_v33 = vld [vmem:[%s5569_s24 + $0x48] sm:$0xff]  }
 0x32a   : > { %4683 = vmatmul.mubr.msk.bf16.vlgmr.msra.gmra.mxu1 %vm1386_vm3, %v1384_v36 }
 0x32b   : > { %4688 = vmatprep.mubr.msk.bf16.mxu1 %vm5332_vm2, %v5331_v16 }
 0x33d   : > { %v1378_v38 = vpop.f32.mrf.mxu0 }
 0x33e   : > { %v1379_v39 = vadd.f32 %v4086_v37, %v1378_v38 }
 0x33f   : > { %v4678_v40 = vpop.f32.mrf.mxu0 }
 0x340   : > { %v1447_v41 = vpack.c.bf16 %v1379_v39, %v1379_v39 }
 0x341   : > { %v1381_v42 = vpop.f32.mrf.mxu0 }
 0x342   : > { %v1453_v43 = vsel %vm1451_vm4, %v1447_v41, 0  ;;  %v4114_v42 = vld [vmem:[%s5553_s26 + $0x1] ss:$0 sm:$0xff] }
 0x343   : > { %v4679_v44 = vpop.f32.mrf.mxu0  ;;  %4687 = vmatpush3.bf16.msra.mxu1 %v1453_v43 }
 0x344   : > { %4692 = vmatprep.subr.bf16.mxu1 %v5331_v16 }
 0x35d   : > { %v5795_v46 = vpop.f32.mrf.mxu0 }
 0x35e   : > { %v1716_v34 = vadd.f32 %v4140_v32, %v5795_v46 }
 0x35f   : > { %v4730_v47 = vpop.f32.mrf.mxu0 }
 0x360   : > { %v1835_v36 = vpack.c.bf16 %v1716_v34, %v1716_v34 }
 0x361   : > { %v1718_v48 = vpop.f32.mrf.mxu0 }
 0x362   : > { %v1840_v37 = vsel %vm1386_vm3, %v1835_v36, 0 }
 0x363   : > { %v4731_v49 = vpop.f32.mrf.mxu0 }
 0x37d   : > { %v5797_v50 = vpop.f32.mrf.mxu0 }
 0x37f   : > { %v4782_v51 = vpop.f32.mrf.mxu0 }
 0x380   : > { %v4166_v51 = vld [vmem:[%s6248_s28 + $0x1] ss:$0 sm:$0xff] }
 0x381   : > { %v2052_v52 = vpop.f32.mrf.mxu0 }
 0x383   : > { %v4783_v53 = vpop.f32.mrf.mxu0 }
 0x39d   : > { %v5799_v54 = vpop.f32.mrf.mxu0 }
 0x39f   : > { %v4822_v55 = vpop.f32.mrf.mxu0 }
 0x3a1   : > { %v2278_v56 = vpop.f32.mrf.mxu0 }
 0x3a3   : > { %v4823_v57 = vpop.f32.mrf.mxu0 }
 0x3bd   : > { %v2609_v59 = vpop.f32.mrf.mxu0 }
 0x3be   : > { %v2610_v60 = vadd.f32 %v4300_v58, %v2609_v59 }
 0x3bf   : > { %v4874_v61 = vpop.f32.mrf.mxu0 }
 0x3c0   : > { %v2729_v62 = vpack.c.bf16 %v2610_v60, %v2610_v60 }
 0x3c1   : > { %v2612_v63 = vpop.f32.mrf.mxu0 }
 0x3c2   : > { %v2734_v0 = vsel %vm1386_vm3, %v2729_v62, 0 }
 0x3c3   : > { %v4875_v1 = vpop.f32.mrf.mxu0  ;;  %4897 = vmatpush3.bf16.xpose.msra.mxu0 %v2734_v0 }
 0x3c4   : > { %4902 = vmatprep.subr.bf16.mxu0 %v5331_v16 }
 0x3ea   : > { %v1427_v2 = vpop.f32.mrf.mxu1 }
 0x3eb   : > { %v1433_v3 = vmul.f32 0.17677669, %v1427_v2 }
 0x3ec   : > { %v4684_v4 = vpop.f32.mrf.mxu1 }
 0x3ed   : > { %v1435_v5 = vsel %vm1434_vm5, %v1433_v3, -inf }
 0x3ee   : > { %1436 = vmax.xlane.f32.xlu1 %v1435_v5  ;;  %v1430_v6 = vpop.f32.mrf.mxu1 }
 0x3f0   : > { %v4685_v7 = vpop.f32.mrf.mxu1 }
 0x477   : > { %v1437_v8 = vpop.xlane.xlu1 %1436 }
 0x478   : > { %v1438_v9 = vsub.f32 %v1433_v3, %v1437_v8 }
 0x47a   : > { %v1439_v10 = vmul.f32 1.442695, %v1438_v9 }
 0x47c   : > { %5198 = vpow2.f32 %v1439_v10  ;;  %v5084_v10 = vld [vmem:[%s5558_s0 + $0xb8] sm:$0xff]  }
 0x489   : > { %v5199_v11 = vpop.eup %5198 }
 0x48a   : > { %v1441_v12 = vsel %vm1434_vm5, %v5199_v11, 0.0 }
 0x48b   : > { %1442 = vadd.xlane.f32.xlu1 %v1441_v12  ;;  %v5085_v12 = vld [vmem:[%s5558_s0 + $0xb0] sm:$0xff]  }
 0x514   : > { %v1443_v13 = vpop.xlane.xlu1 %1442 }
 0x515   : > { %5200 = vrcp.f32 %v1443_v13  ;;  %v5086_v13 = vld [vmem:[%s5558_s0 + $0xa8] sm:$0xff]  }
 0x522   : > { %v5201_v14 = vpop.eup %5200 }
 0x523   : > { %v1445_v15 = vmul.f32 %v5201_v14, %v5199_v11  ;;  %v5087_v14 = vld [vmem:[%s5558_s0 + $0xa0] sm:$0xff]  }
 0x525   : > { %v1446_v18 = vpack.c.bf16 %v1445_v15, %v1445_v15  ;;  %v5088_v15 = vld [vmem:[%s5558_s0 + $0x98] sm:$0xff]  }
 0x527   : > { %4689 = vmatmul.mubr.msk.bf16.vlgmr.msra.gmra.mxu1 %vm1434_vm5, %v1446_v18  ;;  %v5090_v18 = vld [vmem:[%s5558_s0 + $0x88] sm:$0xff]  }
 0x528   : > { %4693 = vmatpush3.bf16.msra.mxu1 %v5068_v17  ;;  %4708 = vmatprep.mubr.msk.bf16.mxu1 %vm5332_vm2, %v5331_v16  ;;  %v5089_v17 = vld [vmem:[%s5558_s0 + $0x90] sm:$0xff]  }
 0x529   : > { %4694 = vmatprep.subr.bf16.mxu1 %v5331_v16 }
 0x52c   : > { %4695 = vmatpush3.bf16.msra.mxu1 %v5069_v19  ;;  %v5091_v19 = vld [vmem:[%s5558_s0 + $0x80] sm:$0xff]   ;;  %s5334_s0 = smov 64  }
 0x52d   : > { %4696 = vmatprep.subr.bf16.mxu1 %v5331_v16 }
 0x530   : > { %4697 = vmatpush3.bf16.msra.mxu1 %v5070_v20 }
 0x531   : > { %4698 = vmatprep.subr.bf16.mxu1 %v5331_v16 }
 0x534   : > { %4699 = vmatpush3.bf16.msra.mxu1 %v5071_v21 }
 0x535   : > { %4700 = vmatprep.subr.bf16.mxu1 %v5331_v16 }
 0x538   : > { %4701 = vmatpush3.bf16.msra.mxu1 %v5072_v22 }
 0x539   : > { %4702 = vmatprep.subr.bf16.mxu1 %v5331_v16 }
 0x53c   : > { %4703 = vmatpush3.bf16.msra.mxu1 %v5073_v23 }
 0x53d   : > { %4704 = vmatprep.subr.bf16.mxu1 %v5331_v16 }
 0x540   : > { %4705 = vmatpush3.bf16.msra.mxu1 %v5074_v24  ;;  %v4220_v24 = vld [vmem:[%s5564_s17 + $0x2] ss:$0 sm:$0xff]  ;;  %s5335_s17 = smov 96  }
 0x541   : > { %4706 = vmatprep.subr.bf16.mxu1 %v5331_v16 }
 0x544   : > { %4707 = vmatpush3.bf16.msra.mxu1 %v5075_v25 }
 0x545   : > { %4732 = vmatprep.subr.bf16.mxu1 %v5331_v16 }
 0x547   : > { %4709 = vmatmul.mubr.bf16.vlgmr.msra.gmra.mxu1 %v5683_v45 }
 0x548   : > { %4733 = vmatpush3.bf16.msra.mxu1 %v5076_v26  ;;  %4748 = vmatprep.mubr.msk.bf16.mxu1 %vm5332_vm2, %v5331_v16 }
 0x549   : > { %4734 = vmatprep.subr.bf16.mxu1 %v5331_v16 }
 0x54c   : > { %4735 = vmatpush3.bf16.msra.mxu1 %v5077_v27  ;;  %v4246_v27 = vld [vmem:[%s6248_s28 + $0x2] ss:$0 sm:$0xff] }
 0x54d   : > { %4736 = vmatprep.subr.bf16.mxu1 %v5331_v16  ;;  %v2276_v32 = vadd.f32 %v4246_v27, %v5799_v54 }
 0x54f   : > { %v2342_v36 = vpack.c.bf16 %v2276_v32, %v2276_v32 }
 0x550   : > { %4737 = vmatpush3.bf16.msra.mxu1 %v5078_v28 }
 0x551   : > { %4738 = vmatprep.subr.bf16.mxu1 %v5331_v16 }
 0x554   : > { %4739 = vmatpush3.bf16.msra.mxu1 %v5079_v29 }
 0x555   : > { %4740 = vmatprep.subr.bf16.mxu1 %v5331_v16 }
 0x558   : > { %4741 = vmatpush3.bf16.msra.mxu1 %v5080_v30  ;;  %v4194_v30 = vld [vmem:[%s5553_s26 + $0x2] ss:$0 sm:$0xff] }
 0x559   : > { %4742 = vmatprep.subr.bf16.mxu1 %v5331_v16 }
 0x55c   : > { %4743 = vmatpush3.bf16.msra.mxu1 %v5081_v31 }
 0x55d   : > { %4744 = vmatprep.subr.bf16.mxu1 %v5331_v16 }
 0x560   : > { %4745 = vmatpush3.bf16.msra.mxu1 %v5082_v33 }
 0x561   : > { %4746 = vmatprep.subr.bf16.mxu1 %v5331_v16 }
 0x564   : > { %4747 = vmatpush3.bf16.msra.mxu1 %v5083_v35  ;;  %v2050_v35 = vadd.f32 %v4194_v30, %v5797_v50 }
 0x565   : > { %4752 = vmatprep.subr.bf16.mxu1 %v5331_v16 }
 0x567   : > { %4749 = vmatmul.mubr.bf16.vlgmr.msra.gmra.mxu1 %v5683_v45 }
 0x568   : > { %4753 = vmatpush3.bf16.xpose.msra.mxu1 %v1840_v37  ;;  %4754 = vmatprep.mubr.msk.bf16.mxu1 %vm5332_vm2, %v5331_v16  ;;  %v2281_v37 = vpack.c.bf16 %v2050_v35, %v2050_v35 }
 0x569   : > { %4758 = vmatprep.subr.bf16.mxu1 %v5331_v16 }
 0x5e7   : > { %v5851_v38 = vpop.f32.mrf.mxu1 }
 0x5e9   : > { %v4690_v39 = vpop.f32.mrf.mxu1 }
 0x5ea   : > { %v2347_v39 = vsel %vm1451_vm4, %v2342_v36, 0 }
 0x5eb   : > { %v1492_v40 = vpop.f32.mrf.mxu1 }
 0x5ed   : > { %v4691_v41 = vpop.f32.mrf.mxu1 }
 0x607   : > { %v1602_v43 = vpop.f32.mrf.mxu1 }
 0x608   : > { %v1603_v44 = vadd.f32 %v4114_v42, %v1602_v43 }
 0x609   : > { %v4710_v46 = vpop.f32.mrf.mxu1 }
 0x60a   : > { %v1834_v47 = vpack.c.bf16 %v1603_v44, %v1603_v44 }
 0x60b   : > { %v1605_v48 = vpop.f32.mrf.mxu1 }
 0x60c   : > { %4755 = vmatmul.mubr.msk.bf16.vlgmr.msra.gmra.mxu1 %vm1386_vm3, %v1834_v47 }
 0x60d   : > { %v4711_v49 = vpop.f32.mrf.mxu1  ;;  %4760 = vmatprep.mubr.msk.bf16.mxu1 %vm5332_vm2, %v5331_v16 }
 0x627   : > { %v1828_v52 = vpop.f32.mrf.mxu1 }
 0x628   : > { %v1829_v53 = vadd.f32 %v4166_v51, %v1828_v52 }
 0x629   : > { %v4750_v55 = vpop.f32.mrf.mxu1 }
 0x62a   : > { %v1895_v56 = vpack.c.bf16 %v1829_v53, %v1829_v53  ;;  %v5092_v55 = vld [vmem:[%s5544_s2 + $0xf8] sm:$0xff]  }
 0x62b   : > { %v1831_v57 = vpop.f32.mrf.mxu1 }
 0x62c   : > { %v1900_v58 = vsel %vm1451_vm4, %v1895_v56, 0  ;;  %v5093_v57 = vld [vmem:[%s5544_s2 + $0xf0] sm:$0xff]  }
 0x62d   : > { %v4751_v59 = vpop.f32.mrf.mxu1  ;;  %4759 = vmatpush3.bf16.msra.mxu1 %v1900_v58  ;;  %v5094_v58 = vld [vmem:[%s5544_s2 + $0xe8] sm:$0xff]  }
 0x62e   : > { %4784 = vmatprep.subr.bf16.mxu1 %v5331_v16  ;;  %v5095_v59 = vld [vmem:[%s5544_s2 + $0xe0] sm:$0xff]  }
 0x6cc   : > { %v1876_v60 = vpop.f32.mrf.mxu1 }
 0x6cd   : > { %v1882_v61 = vmul.f32 0.17677669, %v1876_v60  ;;  %v5096_v60 = vld [vmem:[%s5544_s2 + $0xd8] sm:$0xff]  }
 0x6ce   : > { %v4756_v62 = vpop.f32.mrf.mxu1 }
 0x6cf   : > { %v1883_v63 = vsel %vm1434_vm5, %v1882_v61, -inf  ;;  %v5098_v62 = vld [vmem:[%s5544_s2 + $0xc8] sm:$0xff]  }
 0x6d0   : > { %1884 = vmax.xlane.f32.xlu0 %v1883_v63  ;;  %v1879_v0 = vpop.f32.mrf.mxu1  ;;  %v5099_v63 = vld [vmem:[%s5544_s2 + $0xc0] sm:$0xff]  }
 0x6d1   : > { %v5100_v0 = vld [vmem:[%s5569_s24 + $0xf8] sm:$0xff]  }
 0x6d2   : > { %v4757_v1 = vpop.f32.mrf.mxu1 }
 0x6d3   : > { %v5101_v1 = vld [vmem:[%s5569_s24 + $0xf0] sm:$0xff]  }
 0x759   : > { %v1885_v2 = vpop.xlane.xlu0 %1884 }
 0x75a   : > { %v1886_v3 = vsub.f32 %v1882_v61, %v1885_v2  ;;  %v5097_v61 = vld [vmem:[%s5544_s2 + $0xd0] sm:$0xff]   ;;  %v5102_v2 = vld [vmem:[%s5569_s24 + $0xe8] sm:$0xff]   ;;  %s5333_s2 = smov 32  }
 0x75c   : > { %v1887_v4 = vmul.f32 1.442695, %v1886_v3  ;;  %v5103_v3 = vld [vmem:[%s5569_s24 + $0xe0] sm:$0xff]  }
 0x75e   : > { %5202 = vpow2.f32 %v1887_v4  ;;  %v5104_v4 = vld [vmem:[%s5569_s24 + $0xd8] sm:$0xff]  }
 0x76b   : > { %v5203_v5 = vpop.eup %5202 }
 0x76c   : > { %v1889_v6 = vsel %vm1434_vm5, %v5203_v5, 0.0 }
 0x76d   : > { %1890 = vadd.xlane.f32.xlu1 %v1889_v6  ;;  %v5106_v6 = vld [vmem:[%s5569_s24 + $0xc8] sm:$0xff]  }
 0x7f6   : > { %v1891_v7 = vpop.xlane.xlu1 %1890 }
 0x7f7   : > { %5204 = vrcp.f32 %v1891_v7  ;;  %v5107_v7 = vld [vmem:[%s5569_s24 + $0xc0] sm:$0xff]  }
 0x804   : > { %v5205_v8 = vpop.eup %5204 }
 0x805   : > { %v1893_v9 = vmul.f32 %v5205_v8, %v5203_v5  ;;  %v5105_v5 = vld [vmem:[%s5569_s24 + $0xd0] sm:$0xff]  }
 0x807   : > { %v1894_v11 = vpack.c.bf16 %v1893_v9, %v1893_v9 }
 0x809   : > { %4761 = vmatmul.mubr.msk.bf16.vlgmr.msra.gmra.mxu1 %vm1434_vm5, %v1894_v11 }
 0x80a   : > { %4785 = vmatpush3.bf16.msra.mxu1 %v5084_v10  ;;  %4800 = vmatprep.mubr.msk.bf16.mxu1 %vm5332_vm2, %v5331_v16 }
 0x80b   : > { %4786 = vmatprep.subr.bf16.mxu1 %v5331_v16 }
 0x80e   : > { %4787 = vmatpush3.bf16.msra.mxu1 %v5085_v12  ;;  %v4274_v12 = vld [vmem:[%s5553_s26 + $0x3] ss:$0 sm:$0xff]  ;;  %s6249_s26 = sld [smem:[#allocation19_spill]] }
 0x80f   : > { %4788 = vmatprep.subr.bf16.mxu1 %v5331_v16 }
 0x812   : > { %4789 = vmatpush3.bf16.msra.mxu1 %v5086_v13 }
 0x813   : > { %4790 = vmatprep.subr.bf16.mxu1 %v5331_v16 }
 0x816   : > { %4791 = vmatpush3.bf16.msra.mxu1 %v5087_v14 }
 0x817   : > { %4792 = vmatprep.subr.bf16.mxu1 %v5331_v16 }
 0x81a   : > { %4793 = vmatpush3.bf16.msra.mxu1 %v5088_v15 }
 0x81b   : > { %4794 = vmatprep.subr.bf16.mxu1 %v5331_v16 }
 0x81e   : > { %4795 = vmatpush3.bf16.msra.mxu1 %v5089_v17 }
 0x81f   : > { %4796 = vmatprep.subr.bf16.mxu1 %v5331_v16 }
 0x822   : > { %4797 = vmatpush3.bf16.msra.mxu1 %v5090_v18 }
 0x823   : > { %4798 = vmatprep.subr.bf16.mxu1 %v5331_v16 }
 0x826   : > { %4799 = vmatpush3.bf16.msra.mxu1 %v5091_v19 }
 0x827   : > { %4824 = vmatprep.subr.bf16.mxu1 %v5331_v16 }
 0x829   : > { %4801 = vmatmul.mubr.bf16.vlgmr.msra.gmra.mxu1 %v5683_v45 }
 0x82a   : > { %4826 = vmatprep.mubr.msk.bf16.mxu1 %vm5332_vm2, %v5331_v16 }
 0x8c9   : > { %v5884_v20 = vpop.f32.mrf.mxu1 }
 0x8cb   : > { %v4762_v21 = vpop.f32.mrf.mxu1 }
 0x8cc   : > { %v4326_v21 = vld [vmem:[%s6248_s28 + $0x3] ss:$0 sm:$0xff] }
 0x8cd   : > { %v1939_v22 = vpop.f32.mrf.mxu1 }
 0x8cf   : > { %v4763_v23 = vpop.f32.mrf.mxu1 }
 0x8e9   : > { %v2162_v25 = vpop.f32.mrf.mxu1 }
 0x8ea   : > { %v2163_v26 = vadd.f32 %v4220_v24, %v2162_v25 }
 0x8eb   : > { %v4802_v28 = vpop.f32.mrf.mxu1 }
 0x8ec   : > { %v2282_v29 = vpack.c.bf16 %v2163_v26, %v2163_v26 }
 0x8ed   : > { %v2165_v31 = vpop.f32.mrf.mxu1 }
 0x8ee   : > { %v2287_v33 = vsel %vm1386_vm3, %v2282_v29, 0 }
 0x8ef   : > { %v4803_v34 = vpop.f32.mrf.mxu1  ;;  %4825 = vmatpush3.bf16.xpose.msra.mxu1 %v2287_v33 }
 0x8f0   : > { %4830 = vmatprep.subr.bf16.mxu1 %v5331_v16 }
 0x8f6   : > { %4827 = vmatmul.mubr.msk.bf16.vlgmr.msra.gmra.mxu1 %vm1386_vm3, %v2281_v37 }
 0x8f7   : > { %4831 = vmatpush3.bf16.msra.mxu1 %v2347_v39  ;;  %4832 = vmatprep.mubr.msk.bf16.mxu1 %vm5332_vm2, %v5331_v16 }
 0x8f8   : > { %4836 = vmatprep.subr.bf16.mxu1 %v5331_v16 }
 0x9b6   : > { %v2323_v54 = vpop.f32.mrf.mxu1 }
 0x9b7   : > { %v2329_v40 = vmul.f32 0.17677669, %v2323_v54 }
 0x9b8   : > { %v4828_v41 = vpop.f32.mrf.mxu1 }
 0x9b9   : > { %v2330_v50 = vsel %vm1434_vm5, %v2329_v40, -inf }
 0x9ba   : > { %2331 = vmax.xlane.f32.xlu0 %v2330_v50  ;;  %v2326_v42 = vpop.f32.mrf.mxu1  ;;  %v5108_v50 = vld [vmem:[%s6249_s26 + $0x38] sm:$0xff]  }
 0x9bb   : > { %v5109_v42 = vld [vmem:[%s6249_s26 + $0x30] sm:$0xff]  }
 0x9bc   : > { %v4829_v43 = vpop.f32.mrf.mxu1 }
 0x9bd   : > { %v5110_v43 = vld [vmem:[%s6249_s26 + $0x28] sm:$0xff]  }
 0xa43   : > { %v2332_v44 = vpop.xlane.xlu0 %2331 }
 0xa44   : > { %v2333_v46 = vsub.f32 %v2329_v40, %v2332_v44  ;;  %v5111_v44 = vld [vmem:[%s6249_s26 + $0x20] sm:$0xff]  }
 0xa46   : > { %v2334_v47 = vmul.f32 1.442695, %v2333_v46  ;;  %v5112_v46 = vld [vmem:[%s6249_s26 + $0x18] sm:$0xff]  }
 0xa48   : > { %5206 = vpow2.f32 %v2334_v47  ;;  %v5113_v47 = vld [vmem:[%s6249_s26 + $0x10] sm:$0xff]  }
 0xa55   : > { %v5207_v48 = vpop.eup %5206 }
 0xa56   : > { %v2336_v49 = vsel %vm1434_vm5, %v5207_v48, 0.0 }
 0xa57   : > { %2337 = vadd.xlane.f32.xlu1 %v2336_v49  ;;  %v5115_v49 = vld [vmem:[%s6249_s26] sm:$0xff]  }
 0xae0   : > { %v2338_v51 = vpop.xlane.xlu1 %2337 }
 0xae1   : > { %5208 = vrcp.f32 %v2338_v51 }
 0xaee   : > { %v5209_v52 = vpop.eup %5208 }
 0xaef   : > { %v2340_v53 = vmul.f32 %v5209_v52, %v5207_v48  ;;  %v5114_v48 = vld [vmem:[%s6249_s26 + $0x8] sm:$0xff]  }
 0xaf1   : > { %v2341_v56 = vpack.c.bf16 %v2340_v53, %v2340_v53 }
 0xaf3   : > { %4833 = vmatmul.mubr.msk.bf16.vlgmr.msra.gmra.mxu1 %vm1434_vm5, %v2341_v56 }
 0xaf4   : > { %4837 = vmatpush3.bf16.msra.mxu1 %v5092_v55  ;;  %4852 = vmatprep.mubr.msk.bf16.mxu1 %vm5332_vm2, %v5331_v16 }
 0xaf5   : > { %4838 = vmatprep.subr.bf16.mxu1 %v5331_v16 }
 0xaf8   : > { %4839 = vmatpush3.bf16.msra.mxu1 %v5093_v57 }
 0xaf9   : > { %4840 = vmatprep.subr.bf16.mxu1 %v5331_v16 }
 0xafc   : > { %4841 = vmatpush3.bf16.msra.mxu1 %v5094_v58 }
 0xafd   : > { %4842 = vmatprep.subr.bf16.mxu1 %v5331_v16 }
 0xb00   : > { %4843 = vmatpush3.bf16.msra.mxu1 %v5095_v59 }
 0xb01   : > { %4844 = vmatprep.subr.bf16.mxu1 %v5331_v16 }
 0xb04   : > { %4845 = vmatpush3.bf16.msra.mxu1 %v5096_v60 }
 0xb05   : > { %4846 = vmatprep.subr.bf16.mxu1 %v5331_v16 }
 0xb08   : > { %4847 = vmatpush3.bf16.msra.mxu1 %v5097_v61 }
 0xb09   : > { %4848 = vmatprep.subr.bf16.mxu1 %v5331_v16 }
 0xb0c   : > { %4849 = vmatpush3.bf16.msra.mxu1 %v5098_v62  ;;  %v4337_v62 = vld [vmem:[%s6250_s21] ss:$0 sm:$0xff] }
 0xb0d   : > { %4850 = vmatprep.subr.bf16.mxu1 %v5331_v16 }
 0xb10   : > { %4851 = vmatpush3.bf16.msra.mxu1 %v5099_v63 }
 0xb11   : > { %4876 = vmatprep.subr.bf16.mxu1 %v5331_v16 }
 0xb13   : > { %4853 = vmatmul.mubr.bf16.vlgmr.msra.gmra.mxu1 %v5683_v45 }
 0xb14   : > { %4877 = vmatpush3.bf16.msra.mxu1 %v5100_v0  ;;  %4892 = vmatprep.mubr.msk.bf16.mxu1 %vm5332_vm2, %v5331_v16 }
 0xb15   : > { %4878 = vmatprep.subr.bf16.mxu1 %v5331_v16 }
 0xb18   : > { %4879 = vmatpush3.bf16.msra.mxu1 %v5101_v1 }
 0xb19   : > { %4880 = vmatprep.subr.bf16.mxu1 %v5331_v16 }
 0xb1c   : > { %4881 = vmatpush3.bf16.msra.mxu1 %v5102_v2 }
 0xb1d   : > { %4882 = vmatprep.subr.bf16.mxu1 %v5331_v16 }
 0xb20   : > { %4883 = vmatpush3.bf16.msra.mxu1 %v5103_v3 }
 0xb21   : > { %4884 = vmatprep.subr.bf16.mxu1 %v5331_v16 }
 0xb24   : > { %4885 = vmatpush3.bf16.msra.mxu1 %v5104_v4 }
 0xb25   : > { %4886 = vmatprep.subr.bf16.mxu1 %v5331_v16 }
 0xb28   : > { %4887 = vmatpush3.bf16.msra.mxu1 %v5105_v5  ;;  %v5116_v5 = vld [vmem:[%s5598_s22 + $0xe0] ss:$16 sps:$4 sm:$0xff]  }
 0xb29   : > { %4888 = vmatprep.subr.bf16.mxu1 %v5331_v16 }
 0xb2c   : > { %4889 = vmatpush3.bf16.msra.mxu1 %v5106_v6  ;;  %v5118_v6 = vld [vmem:[%s5598_s22 + $0xe4] ss:$16 sps:$4 sm:$0xff]  }
 0xb2d   : > { %4890 = vmatprep.subr.bf16.mxu1 %v5331_v16 }
 0xb30   : > { %4891 = vmatpush3.bf16.msra.mxu1 %v5107_v7  ;;  %v5119_v7 = vld [vmem:[%s5598_s22 + $0xe8] ss:$16 sps:$4 sm:$0xff]  }
 0xb31   : > { %3208 = vmatprep.subr.bf16.mxu1 %v5118_v6  ;;  %v5181_v6 = vld [vmem:[%s5607_s27 + $0xd8] sm:$0xff]  }
 0xb33   : > { %4893 = vmatmul.mubr.bf16.vlgmr.msra.gmra.mxu1 %v5683_v45 }
 0xb34   : > { %3209 = vmatpush1.bf16.msra.mxu1 %v5116_v5  ;;  %v5180_v5 = vld [vmem:[%s5607_s27 + $0x58] sm:$0xff]  }
 0xbb3   : > { %v2383_v8 = vpop.f32.mrf.mxu1 }
 0xbb5   : > { %v4834_v9 = vpop.f32.mrf.mxu1 }
 0xbb6   : > { %v5124_v9 = vld [vmem:[%s5598_s22 + $0xc4] ss:$16 sps:$4 sm:$0xff]  }
 0xbb7   : > { %v2386_v10 = vpop.f32.mrf.mxu1  ;;  %3210 = vmatprep.subr.bf16.mxu1 %v5124_v9  ;;  %v5184_v9 = vld [vmem:[%s5607_s27 + $0x50] sm:$0xff]  }
 0xbb8   : > { %v5127_v10 = vld [vmem:[%s5598_s22 + $0xcc] ss:$16 sps:$4 sm:$0xff]  }
 0xbb9   : > { %v4835_v11 = vpop.f32.mrf.mxu1 }
 0xbba   : > { %v5122_v11 = vld [vmem:[%s5598_s22 + $0xc0] ss:$16 sps:$4 sm:$0xff]  }
 0xbbb   : > { %3211 = vmatpush1.bf16.msra.mxu1 %v5122_v11  ;;  %v5186_v11 = vld [vmem:[%s5607_s27 + $0x10] sm:$0xff]  }
 0xbd3   : > { %v2496_v13 = vpop.f32.mrf.mxu1 }
 0xbd4   : > { %v2497_v14 = vadd.f32 %v4274_v12, %v2496_v13  ;;  %v5125_v12 = vld [vmem:[%s5598_s22 + $0xc8] ss:$16 sps:$4 sm:$0xff]  }
 0xbd5   : > { %v4854_v15 = vpop.f32.mrf.mxu1 }
 0xbd6   : > { %v2728_v17 = vpack.c.bf16 %v2497_v14, %v2497_v14 }
 0xbd7   : > { %v2499_v18 = vpop.f32.mrf.mxu1 }
 0xbd8   : > { %4899 = vmatmul.mubr.msk.bf16.vlgmr.msra.gmra.mxu0 %vm1386_vm3, %v2728_v17  ;;  %v5130_v18 = vld [vmem:[%s5598_s22 + $0xa4] ss:$16 sps:$4 sm:$0xff]  }
 0xbd9   : > { %v4855_v19 = vpop.f32.mrf.mxu1  ;;  %4904 = vmatprep.mubr.msk.bf16.mxu0 %vm5332_vm2, %v5331_v16  ;;  %3212 = vmatprep.subr.bf16.mxu1 %v5130_v18  ;;  %v5192_v18 = vld [vmem:[%s5607_s27 + $0x40] sm:$0xff]  }
 0xbda   : > { %v5133_v19 = vld [vmem:[%s5598_s22 + $0xac] ss:$16 sps:$4 sm:$0xff]  }
 0xbf3   : > { %v2722_v22 = vpop.f32.mrf.mxu1 }
 0xbf4   : > { %v2723_v23 = vadd.f32 %v4326_v21, %v2722_v22  ;;  %v5128_v21 = vld [vmem:[%s5598_s22 + $0xa0] ss:$16 sps:$4 sm:$0xff]   ;;  %v5131_v22 = vld [vmem:[%s5598_s22 + $0xa8] ss:$16 sps:$4 sm:$0xff]  }
 0xbf5   : > { %v4894_v45 = vpop.f32.mrf.mxu1  ;;  %3213 = vmatpush1.bf16.msra.mxu1 %v5128_v21  ;;  %v5194_v21 = vld [vmem:[%s5607_s27] sm:$0xff]  }
 0xbf6   : > { %v2789_v24 = vpack.c.bf16 %v2723_v23, %v2723_v23  ;;  %v5134_v23 = vld [vmem:[%s5598_s22 + $0x80] ss:$16 sps:$4 sm:$0xff]   ;;  %v5136_v45 = vld [vmem:[%s5598_s22 + $0x84] ss:$16 sps:$4 sm:$0xff]  }
 0xbf7   : > { %v2725_v25 = vpop.f32.mrf.mxu1  ;;  %3214 = vmatprep.subr.bf16.mxu1 %v5136_v45 }
 0xbf8   : > { %v2794_v26 = vsel %vm1451_vm4, %v2789_v24, 0  ;;  %v5137_v24 = vld [vmem:[%s5598_s22 + $0x88] ss:$16 sps:$4 sm:$0xff]   ;;  %v5139_v25 = vld [vmem:[%s5598_s22 + $0x8c] ss:$16 sps:$4 sm:$0xff]  }
 0xbf9   : > { %v4895_v27 = vpop.f32.mrf.mxu1  ;;  %4903 = vmatpush3.bf16.msra.mxu0 %v2794_v26  ;;  %v5142_v26 = vld [vmem:[%s5598_s22 + $0x64] ss:$16 sps:$4 sm:$0xff]   ;;  %3215 = vmatpush1.bf16.msra.mxu1 %v5134_v23  ;;  %v3028_v23 = vlaneseq }
 0xbfa   : > { %4908 = vmatprep.subr.bf16.mxu0 %v5331_v16  ;;  %v5145_v27 = vld [vmem:[%s5598_s22 + $0x6c] ss:$16 sps:$4 sm:$0xff]   ;;  %3216 = vmatprep.subr.bf16.mxu1 %v5142_v26  ;;  %v3026_v26 = vld [vmem:[%s927_s11] sm:$0xf] }
 0xbfb   : > { %v3029_v45 = vshrl.u32 %v3028_v23, 7 }
 0xc98   : > { %v2770_v28 = vpop.f32.mrf.mxu0 }
 0xc99   : > { %v2776_v29 = vmul.f32 0.17677669, %v2770_v28  ;;  %v5140_v28 = vld [vmem:[%s5598_s22 + $0x60] ss:$16 sps:$4 sm:$0xff]  }
 0xc9a   : > { %v4900_v30 = vpop.f32.mrf.mxu0  ;;  %3217 = vmatpush1.bf16.msra.mxu1 %v5140_v28  ;;  %v3042_v28 = vsub.s32 3, %v3029_v45 }
 0xc9b   : > { %v2777_v31 = vsel %vm1434_vm5, %v2776_v29, -inf  ;;  %v5148_v30 = vld [vmem:[%s5598_s22 + $0x44] ss:$16 sps:$4 sm:$0xff]  }
 0xc9c   : > { %2778 = vmax.xlane.f32.xlu0 %v2777_v31  ;;  %v2773_v32 = vpop.f32.mrf.mxu0  ;;  %v5151_v31 = vld [vmem:[%s5598_s22 + $0x4c] ss:$16 sps:$4 sm:$0xff]   ;;  %3218 = vmatprep.subr.bf16.mxu1 %v5148_v30 }
 0xc9d   : > { %v5146_v32 = vld [vmem:[%s5598_s22 + $0x40] ss:$16 sps:$4 sm:$0xff]  }
 0xc9e   : > { %v4901_v33 = vpop.f32.mrf.mxu0  ;;  %3219 = vmatpush1.bf16.msra.mxu1 %v5146_v32 }
 0xc9f   : > { %v5336_v33 = vmov 0  }
 0xca0   : > { %3240 = vmatprep.mubr.bf16.mxu1 %v5336_v33 }
 0xcb2   : > { %2837 = vrot.lane.b32.xlu0 %v5884_v20, %s5333_s2  ;;  %s6258_s2 = sld [smem:[#allocation37_spill]] (!%p4413_p1) }
 0xd25   : > { %v2779_v34 = vpop.xlane.xlu0 %2778 }
 0xd26   : > { %v2780_v35 = vsub.f32 %v2776_v29, %v2779_v34  ;;  %v5143_v29 = vld [vmem:[%s5598_s22 + $0x68] ss:$16 sps:$4 sm:$0xff]  }
 0xd27   : > { %v5149_v34 = vld [vmem:[%s5598_s22 + $0x48] ss:$16 sps:$4 sm:$0xff]  }
 0xd28   : > { %v2781_v36 = vmul.f32 1.442695, %v2780_v35  ;;  %v5154_v35 = vld [vmem:[%s5598_s22 + $0x24] ss:$16 sps:$4 sm:$0xff]  }
 0xd29   : > { %v2838_v56 = vpop.permute.xlu0 %2837  ;;  %3220 = vmatprep.subr.bf16.mxu1 %v5154_v35 }
 0xd2a   : > { %5210 = vpow2.f32 %v2781_v36  ;;  %v2848_v58 = vsel %vm1386_vm3, %v5851_v38, %v2838_v56  ;;  %v5232_v38 = vld [vmem:[%s5613_s9] sm:$0xff]  ;;  %v5166_v56 = vld [vmem:[%s5607_s27 + $0x38] sm:$0xff]  }
 0xd2b   : > { %v5157_v36 = vld [vmem:[%s5598_s22 + $0x2c] ss:$16 sps:$4 sm:$0xff]  }
 0xd37   : > { %v5211_v37 = vpop.eup %5210 }
 0xd38   : > { %v2783_v39 = vsel %vm1434_vm5, %v5211_v37, 0.0 }
 0xd39   : > { %2784 = vadd.xlane.f32.xlu1 %v2783_v39  ;;  %v5155_v39 = vld [vmem:[%s5598_s22 + $0x28] ss:$16 sps:$4 sm:$0xff]  }
 0xd4a   : > { %2841 = vrot.lane.b32.xlu1 %v2383_v8, %s5334_s0  ;;  %v5121_v8 = vld [vmem:[%s5598_s22 + $0xec] ss:$16 sps:$4 sm:$0xff]  }
 0xdc2   : > { %v2785_v54 = vpop.xlane.xlu1 %2784 }
 0xdc3   : > { %5212 = vrcp.f32 %v2785_v54  ;;  %v5160_v54 = vld [vmem:[%s5598_s22 + $0x4] ss:$16 sps:$4 sm:$0xff]  }
 0xdc6   : > { %v2842_v57 = vpop.permute.xlu1 %2841 }
 0xdd0   : > { %v5213_v40 = vpop.eup %5212 }
 0xdd1   : > { %v2787_v41 = vmul.f32 %v5213_v40, %v5211_v37  ;;  %v5152_v37 = vld [vmem:[%s5598_s22 + $0x20] ss:$16 sps:$4 sm:$0xff]   ;;  %v5163_v40 = vld [vmem:[%s5598_s22 + $0xc] ss:$16 sps:$4 sm:$0xff]  }
 0xdd2   : > { %3221 = vmatpush1.bf16.msra.mxu1 %v5152_v37 }
 0xdd3   : > { %v2788_v20 = vpack.c.bf16 %v2787_v41, %v2787_v41  ;;  %v5158_v41 = vld [vmem:[%s5598_s22] ss:$16 sps:$4 sm:$0xff]   ;;  %3222 = vmatprep.subr.bf16.mxu1 %v5160_v54 }
 0xdd5   : > { %4905 = vmatmul.mubr.msk.bf16.vlgmr.msra.gmra.mxu0 %vm1434_vm5, %v2788_v20  ;;  %v5161_v20 = vld [vmem:[%s5598_s22 + $0x8] ss:$16 sps:$4 sm:$0xff]  }
 0xdd6   : > { %4924 = vmatprep.mubr.msk.bf16.mxu0 %vm5332_vm2, %v5331_v16  ;;  %4909 = vmatpush3.bf16.msra.mxu0 %v5108_v50 }
 0xdd7   : > { %4910 = vmatprep.subr.bf16.mxu0 %v5331_v16  ;;  %3223 = vmatpush1.bf16.msra.mxu1 %v5158_v41 }
 0xdda   : > { %4911 = vmatpush3.bf16.msra.mxu0 %v5109_v42 }
 0xddb   : > { %4912 = vmatprep.subr.bf16.mxu0 %v5331_v16 }
 0xdde   : > { %4913 = vmatpush3.bf16.msra.mxu0 %v5110_v43 }
 0xddf   : > { %4914 = vmatprep.subr.bf16.mxu0 %v5331_v16 }
 0xde2   : > { %4915 = vmatpush3.bf16.msra.mxu0 %v5111_v44 }
 0xde3   : > { %4916 = vmatprep.subr.bf16.mxu0 %v5331_v16 }
 0xde6   : > { %4917 = vmatpush3.bf16.msra.mxu0 %v5112_v46  ;;  %v4346_v46 = vld [vmem:[%s6252_s18] ss:$0 sm:$0xff] }
 0xde7   : > { %4918 = vmatprep.subr.bf16.mxu0 %v5331_v16 }
 0xdea   : > { %4919 = vmatpush3.bf16.msra.mxu0 %v5113_v47 }
 0xdeb   : > { %4920 = vmatprep.subr.bf16.mxu0 %v5331_v16 }
 0xdee   : > { %4921 = vmatpush3.bf16.msra.mxu0 %v5114_v48  ;;  %v4347_v48 = vld [vmem:[%s6253_s7] ss:$0 sm:$0xff] }
 0xdef   : > { %4922 = vmatprep.subr.bf16.mxu0 %v5331_v16  ;;  %v2850_v16 = vsel %vm2849_vm6, %v2848_v58, %v2842_v57  ;;  %v5167_v57 = vld [vmem:[%s5607_s27 + $0xb8] sm:$0xff]   ;;  %v5168_v58 = vld [vmem:[%s5607_s27 + $0x70] sm:$0xff]  }
 0xdf2   : > { %4923 = vmatpush3.bf16.msra.mxu0 %v5115_v49 }
 0xdf3   : > { %3249 = vmatprep.subr.bf16.mxu0 %v5121_v8  ;;  %v5183_v8 = vld [vmem:[%s5607_s27 + $0x98] sm:$0xff]  }
 0xe95   : > { %v2830_v51 = vpop.f32.mrf.mxu0 }
 0xe96   : > { %2845 = vrot.lane.b32.xlu1 %v2830_v51, %s5335_s17 }
 0xe97   : > { %v4906_v52 = vpop.f32.mrf.mxu0 }
 0xe99   : > { %v2833_v53 = vpop.f32.mrf.mxu0 }
 0xe9a   : > { %v5164_v53 = vld [vmem:[%s5607_s27 + $0x78] sm:$0xff]  }
 0xe9b   : > { %v4907_v55 = vpop.f32.mrf.mxu0  ;;  %4564 = vmatprep.subr.bf16.mxu1 %v5164_v53 }
 0xe9c   : > { %v5165_v55 = vld [vmem:[%s5607_s27 + $0xf8] sm:$0xff]  }
 0xf08   : > { %v2846_v59 = vpop.permute.xlu1 %2845 }
 0xf09   : > { %v2852_v60 = vsel %vm2851_vm7, %v2850_v16, %v2846_v59  ;;  %v5169_v16 = vld [vmem:[%s5607_s27 + $0xf0] sm:$0xff]  }
 0xf0a   : > { %v2853_v61 = vpack.c.bf16 %v2852_v60, %v2852_v60  ;;  %v5170_v59 = vld [vmem:[%s5607_s27 + $0x30] sm:$0xff]  }
 0xf0b   : > { %v5171_v60 = vld [vmem:[%s5607_s27 + $0xb0] sm:$0xff]  }
 0xf0c   : > { %4925 = vmatmul.mubr.bf16.vlgmr.msra.gmra.mxu0 %v2853_v61  ;;  %v5172_v61 = vld [vmem:[%s5607_s27 + $0x68] sm:$0xff]  }
 0xf0d   : > { %3250 = vmatpush1.bf16.msra.mxu0 %v5119_v7  ;;  %3281 = vmatprep.mubr.bf16.mxu0 %v5336_v33  ;;  %v5182_v7 = vld [vmem:[%s5607_s27 + $0x18] sm:$0xff]  }
 0xf0e   : > { %3251 = vmatprep.subr.bf16.mxu0 %v5127_v10  ;;  %v5185_v10 = vld [vmem:[%s5607_s27 + $0xd0] sm:$0xff]  }
 0xf11   : > { %3252 = vmatpush1.bf16.msra.mxu0 %v5125_v12  ;;  %v5187_v12 = vld [vmem:[%s5607_s27 + $0x90] sm:$0xff]  }
 0xf12   : > { %3253 = vmatprep.subr.bf16.mxu0 %v5133_v19  ;;  %v5193_v19 = vld [vmem:[%s5607_s27 + $0xc0] sm:$0xff]  }
 0xf15   : > { %3254 = vmatpush1.bf16.msra.mxu0 %v5131_v22  ;;  %v5195_v22 = vld [vmem:[%s5607_s27 + $0x80] sm:$0xff]  }
 0xf16   : > { %3255 = vmatprep.subr.bf16.mxu0 %v5139_v25  ;;  %v3038_v25 = vsub.s32 2, %v3029_v45 }
 0xf18   : > { %v3039_v30 = vrot.slane %v3026_v26, %v3038_v25 }
 0xf19   : > { %3256 = vmatpush1.bf16.msra.mxu0 %v5137_v24  ;;  %v3030_v24 = vsub.s32 0, %v3029_v45 }
 0xf1a   : > { %3257 = vmatprep.subr.bf16.mxu0 %v5145_v27  ;;  %v3034_v27 = vsub.s32 1, %v3029_v45 }
 0xf1c   : > { %v3035_v33 = vrot.slane %v3026_v26, %v3034_v27 }
 0xf1d   : > { %3258 = vmatpush1.bf16.msra.mxu0 %v5143_v29  ;;  %v3031_v29 = vrot.slane %v3026_v26, %v3030_v24 }
 0xf1e   : > { %3259 = vmatprep.subr.bf16.mxu0 %v5151_v31 }
 0xf21   : > { %3260 = vmatpush1.bf16.msra.mxu0 %v5149_v34  ;;  %v3043_v34 = vrot.slane %v3026_v26, %v3042_v28 }
 0xf22   : > { %3261 = vmatprep.subr.bf16.mxu0 %v5157_v36 }
 0xf25   : > { %3262 = vmatpush1.bf16.msra.mxu0 %v5155_v39 }
 0xf26   : > { %3263 = vmatprep.subr.bf16.mxu0 %v5163_v40 }
 0xf29   : > { %3264 = vmatpush1.bf16.msra.mxu0 %v5161_v20 }
 0xf2a   : > { %4586 = vmatprep.subr.bf16.mxu0 %v5165_v55 }
 0xfcc   : > { %v2959_v63 = vpop.f32.mrf.mxu0 }
 0xfcd   : > { %v2960_v0 = vadd.f32 %v4337_v62, %v2959_v63  ;;  %v5173_v62 = vld [vmem:[%s5607_s27 + $0xe8] sm:$0xff]  }
 0xfce   : > { %v4926_v1 = vpop.f32.mrf.mxu0  ;;  %v5174_v63 = vld [vmem:[%s5607_s27 + $0x28] sm:$0xff]  }
 0xfcf   : > { %v5974_v2 = vadd.f32 %v5232_v38, %v2960_v0  ;;  %v5175_v0 = vld [vmem:[%s5607_s27 + $0xa8] sm:$0xff]   ;;  %v5176_v1 = vld [vmem:[%s5607_s27 + $0x60] sm:$0xff]  }
 0xfd0   : > { %v2962_v3 = vpop.f32.mrf.mxu0  ;;  %v5177_v38 = vld [vmem:[%s5607_s27 + $0xe0] sm:$0xff]  }
 0xfd1   : > { %2968 = vadd.xlane.f32.xlu1 %v5974_v2  ;;  %v5178_v3 = vld [vmem:[%s5607_s27 + $0x20] sm:$0xff]  }
 0xfd2   : > { %v4927_v4 = vpop.f32.mrf.mxu0 }
 0xfd3   : > { %v5179_v4 = vld [vmem:[%s5607_s27 + $0xa0] sm:$0xff]  }
0x105a   : > { %v2969_v13 = vpop.xlane.xlu1 %2968 }
0x105b   : > { %v2970_v14 = vmul.f32 0.0078125, %v2969_v13  ;;  %v5188_v13 = vld [vmem:[%s5607_s27 + $0x48] sm:$0xff]  }
0x105d   : > { %v2971_v15 = vsub.f32 %v5974_v2, %v2970_v14  ;;  %v5189_v14 = vld [vmem:[%s5607_s27 + $0xc8] sm:$0xff]  }
0x105f   : > { %v2972_v17 = vmul.f32 %v2971_v15, %v2971_v15 }
0x1061   : > { %2973 = vadd.xlane.f32.xlu0 %v2972_v17  ;;  %v5191_v17 = vld [vmem:[%s5607_s27 + $0x88] sm:$0xff]  }
0x10ea   : > { %v2974_v50 = vpop.xlane.xlu0 %2973 }
0x10eb   : > { %v2975_v42 = vmul.f32 0.0078125, %v2974_v50 }
0x10ed   : > { %v2976_v43 = vadd.f32 1e-06, %v2975_v42 }
0x10ef   : > { %5214 = vrsqrt.f32 %v2976_v43 }
0x10fc   : > { %v5215_v44 = vpop.eup %5214 }
0x10fd   : > { %v2978_v47 = vmul.f32 %v5215_v44, %v2971_v15  ;;  %v5190_v15 = vld [vmem:[%s5607_s27 + $0x8] sm:$0xff]  }
0x10ff   : > { %v2985_v49 = vmul.f32 %v4346_v46, %v2978_v47 }
0x1101   : > { %v2992_v51 = vadd.f32 %v4347_v48, %v2985_v49 }
0x1103   : > { %v2993_v52 = vpack.c.bf16 %v2992_v51, %v2992_v51 }
0x1105   : > { %3241 = vmatmul.mubr.bf16.vlgmr.msra.gmra.mxu1 %v2993_v52  ;;  %3282 = vmatmul.mubr.bf16.vlgmr.msra.gmra.mxu0 %v2993_v52 }
0x1106   : > { %4565 = vmatpush3.bf16.msra.mxu1 %v5166_v56  ;;  %4587 = vmatpush3.bf16.msra.mxu0 %v5167_v57 }
0x1107   : > { %4566 = vmatprep.subr.bf16.mxu1 %v5168_v58  ;;  %4588 = vmatprep.subr.bf16.mxu0 %v5169_v16 }
0x110a   : > { %4567 = vmatpush3.bf16.msra.mxu1 %v5170_v59  ;;  %4589 = vmatpush3.bf16.msra.mxu0 %v5171_v60 }
0x110b   : > { %4568 = vmatprep.subr.bf16.mxu1 %v5172_v61  ;;  %4590 = vmatprep.subr.bf16.mxu0 %v5173_v62 }
0x110e   : > { %4569 = vmatpush3.bf16.msra.mxu1 %v5174_v63  ;;  %4591 = vmatpush3.bf16.msra.mxu0 %v5175_v0 }
0x110f   : > { %4570 = vmatprep.subr.bf16.mxu1 %v5176_v1  ;;  %4592 = vmatprep.subr.bf16.mxu0 %v5177_v38 }
0x1112   : > { %4571 = vmatpush3.bf16.msra.mxu1 %v5178_v3  ;;  %4593 = vmatpush3.bf16.msra.mxu0 %v5179_v4 }
0x1113   : > { %4572 = vmatprep.subr.bf16.mxu1 %v5180_v5  ;;  %4594 = vmatprep.subr.bf16.mxu0 %v5181_v6 }
0x1116   : > { %4573 = vmatpush3.bf16.msra.mxu1 %v5182_v7  ;;  %4595 = vmatpush3.bf16.msra.mxu0 %v5183_v8 }
0x1117   : > { %4574 = vmatprep.subr.bf16.mxu1 %v5184_v9  ;;  %4596 = vmatprep.subr.bf16.mxu0 %v5185_v10 }
0x111a   : > { %4575 = vmatpush3.bf16.msra.mxu1 %v5186_v11  ;;  %4597 = vmatpush3.bf16.msra.mxu0 %v5187_v12 }
0x111b   : > { %4576 = vmatprep.subr.bf16.mxu1 %v5188_v13  ;;  %4598 = vmatprep.subr.bf16.mxu0 %v5189_v14 }
0x111e   : > { %4577 = vmatpush3.bf16.msra.mxu1 %v5190_v15  ;;  %4599 = vmatpush3.bf16.msra.mxu0 %v5191_v17 }
0x111f   : > { %4578 = vmatprep.subr.bf16.mxu1 %v5192_v18  ;;  %4600 = vmatprep.subr.bf16.mxu0 %v5193_v19 }
0x1122   : > { %4579 = vmatpush3.bf16.msra.mxu1 %v5194_v21  ;;  %4601 = vmatpush3.bf16.msra.mxu0 %v5195_v22 }
0x11c5   : > { %v3242_v31 = vpop.f32.mrf.mxu1  ;;  %v3283_v32 = vpop.f32.mrf.mxu0 }
0x11c6   : > { %v6057_v35 = vadd.f32 %v3242_v31, %v3031_v29  ;;  %v6059_v36 = vadd.f32 %v3283_v32, %v3039_v30 }
0x11c7   : > { %v3244_v37 = vpop.f32.mrf.mxu1  ;;  %v3285_v39 = vpop.f32.mrf.mxu0 }
0x11c8   : > { %v6062_v54 = vmul.f32 0.70710677, %v6057_v35  ;;  %v6065_v40 = vmul.f32 0.70710677, %v6059_v36  ;;  %v6067_v41 = vadd.f32 %v3244_v37, %v3035_v33  ;;  %v6069_v20 = vadd.f32 %v3285_v39, %v3043_v34 }
0x11c9   : > { %v3246_v50 = vpop.f32.mrf.mxu1  ;;  %v3287_v42 = vpop.f32.mrf.mxu0 }
0x11ca   : > { %v3306_v43 = vand.u32 2147483647, %v6062_v54  ;;  %v3308_v44 = vand.u32 2147483647, %v6065_v40  ;;  %v6074_v46 = vmul.f32 0.70710677, %v6067_v41 }
0x11cb   : > { %v3247_v47 = vpop.f32.mrf.mxu1  ;;  %v3288_v48 = vpop.f32.mrf.mxu0  ;;  %v6078_v53 = vmul.f32 0.70710677, %v6069_v20  ;;  %vm3298_vm8 = vcmp.lt.f32.partialorder %v6062_v54, 0.0  ;;  %vm3300_vm9 = vcmp.lt.f32.partialorder %v6065_v40, 0.0 }
0x11cc   : > { %v3310_v49 = vmul.f32 0.3275911, %v3306_v43  ;;  %v3312_v51 = vmul.f32 0.3275911, %v3308_v44  ;;  %v3307_v52 = vand.u32 2147483647, %v6074_v46 }
0x11cd   : > { %v3309_v16 = vand.u32 2147483647, %v6078_v53  ;;  %v3362_v61 = vsub.f32 0.0, %v3306_v43  ;;  %v3364_v62 = vsub.f32 0.0, %v3308_v44  ;;  %vm3299_vm10 = vcmp.lt.f32.partialorder %v6074_v46, 0.0 }
0x11ce   : > { %v3314_v55 = vadd.f32 1.0, %v3310_v49  ;;  %v3316_v56 = vadd.f32 1.0, %v3312_v51  ;;  %v3311_v57 = vmul.f32 0.3275911, %v3307_v52  ;;  %v3363_v0 = vsub.f32 0.0, %v3307_v52 }
0x11cf   : > { %v3313_v59 = vmul.f32 0.3275911, %v3309_v16  ;;  %v3366_v63 = vmul.f32 %v3362_v61, %v3306_v43  ;;  %v3368_v1 = vmul.f32 %v3364_v62, %v3308_v44  ;;  %v3365_v3 = vsub.f32 0.0, %v3309_v16 }
0x11d0   : > { %5216 = vrcp.f32 %v3314_v55  ;;  %v3315_v58 = vadd.f32 1.0, %v3311_v57  ;;  %v3367_v7 = vmul.f32 %v3363_v0, %v3307_v52  ;;  %v5337_v62 = vmov 1.0  }
0x11d1   : > { %5218 = vrcp.f32 %v3316_v56  ;;  %v3317_v60 = vadd.f32 1.0, %v3313_v59  ;;  %v3370_v6 = vmul.f32 1.442695, %v3366_v63  ;;  %v3374_v9 = vmul.f32 1.442695, %v3368_v1 }
0x11d2   : > { %5220 = vrcp.f32 %v3315_v58  ;;  %v3369_v13 = vmul.f32 %v3365_v3, %v3309_v16  ;;  %v3372_v17 = vmul.f32 1.442695, %v3367_v7  ;;  %v3302_v63 = vsel %vm3298_vm8, -1.0, %v5337_v62 }
0x11d3   : > { %5222 = vrcp.f32 %v3317_v60  ;;  %vm3301_vm11 = vcmp.lt.f32.partialorder %v6078_v53, 0.0 }
0x11d4   : > { %5224 = vpow2.f32 %v3370_v6  ;;  %v3376_v24 = vmul.f32 1.442695, %v3369_v13 }
0x11d5   : > { %5226 = vpow2.f32 %v3374_v9  ;;  %v3303_v9 = vsel %vm3299_vm10, -1.0, %v5337_v62 }
0x11d6   : > { %5228 = vpow2.f32 %v3372_v17 }
0x11d7   : > { %5230 = vpow2.f32 %v3376_v24 }
0x11dd   : > { %v5217_v38 = vpop.eup %5216 }
0x11de   : > { %v5219_v4 = vpop.eup %5218  ;;  %v3326_v5 = vmul.f32 1.0614054, %v5217_v38 }
0x11df   : > { %v3328_v8 = vmul.f32 1.0614054, %v5219_v4  ;;  %v5221_v11 = vpop.eup %5220 }
0x11e0   : > { %v3330_v10 = vadd.f32 -1.4531521, %v3326_v5  ;;  %v3327_v15 = vmul.f32 1.0614054, %v5221_v11  ;;  %v5223_v19 = vpop.eup %5222 }
0x11e1   : > { %v3332_v12 = vadd.f32 -1.4531521, %v3328_v8  ;;  %v3329_v45 = vmul.f32 1.0614054, %v5223_v19  ;;  %v5225_v49 = vpop.eup %5224 }
0x11e2   : > { %v3334_v14 = vmul.f32 %v5217_v38, %v3330_v10  ;;  %v3331_v22 = vadd.f32 -1.4531521, %v3327_v15  ;;  %v5227_v55 = vpop.eup %5226  ;;  %v3305_v15 = vsel %vm3301_vm11, -1.0, %v5337_v62 }
0x11e3   : > { %v3336_v18 = vmul.f32 %v5219_v4, %v3332_v12  ;;  %v3333_v28 = vadd.f32 -1.4531521, %v3329_v45  ;;  %v5229_v61 = vpop.eup %5228 }
0x11e4   : > { %v3338_v21 = vadd.f32 1.4214138, %v3334_v14  ;;  %v3335_v26 = vmul.f32 %v5221_v11, %v3331_v22  ;;  %v5231_v54 = vpop.eup %5230  ;;  %v3291_v14 = vmul.f32 0.5, %v6067_v41  ;;  %v3293_v22 = vmul.f32 0.5, %v6069_v20 }
0x11e5   : > { %v3340_v23 = vadd.f32 1.4214138, %v3336_v18  ;;  %v3337_v32 = vmul.f32 %v5223_v19, %v3333_v28 }
0x11e6   : > { %v3342_v25 = vmul.f32 %v5217_v38, %v3338_v21  ;;  %v3339_v30 = vadd.f32 1.4214138, %v3335_v26 }
0x11e7   : > { %v3344_v27 = vmul.f32 %v5219_v4, %v3340_v23  ;;  %v3341_v39 = vadd.f32 1.4214138, %v3337_v32 }
0x11e8   : > { %v3346_v29 = vadd.f32 -0.28449672, %v3342_v25  ;;  %v3343_v34 = vmul.f32 %v5221_v11, %v3339_v30 }
0x11e9   : > { %v3348_v31 = vadd.f32 -0.28449672, %v3344_v27  ;;  %v3345_v44 = vmul.f32 %v5223_v19, %v3341_v39 }
0x11ea   : > { %v3350_v33 = vmul.f32 %v5217_v38, %v3346_v29  ;;  %v3347_v42 = vadd.f32 -0.28449672, %v3343_v34 }
0x11eb   : > { %v3352_v37 = vmul.f32 %v5219_v4, %v3348_v31  ;;  %v3349_v52 = vadd.f32 -0.28449672, %v3345_v44 }
0x11ec   : > { %v3354_v50 = vadd.f32 0.2548296, %v3350_v33  ;;  %v3351_v48 = vmul.f32 %v5221_v11, %v3347_v42 }
0x11ed   : > { %v3356_v43 = vadd.f32 0.2548296, %v3352_v37  ;;  %v3353_v16 = vmul.f32 %v5223_v19, %v3349_v52 }
0x11ee   : > { %v3358_v47 = vmul.f32 %v5217_v38, %v3354_v50  ;;  %v3355_v57 = vadd.f32 0.2548296, %v3351_v48 }
0x11ef   : > { %v3360_v51 = vmul.f32 %v5219_v4, %v3356_v43  ;;  %v3357_v1 = vadd.f32 0.2548296, %v3353_v16  ;;  %v3304_v4 = vsel %vm3300_vm9, -1.0, %v5337_v62 }
0x11f0   : > { %v3378_v56 = vmul.f32 %v5225_v49, %v3358_v47  ;;  %v3359_v60 = vmul.f32 %v5221_v11, %v3355_v57  ;;  %v3290_v11 = vmul.f32 0.5, %v6057_v35 }
0x11f1   : > { %v3380_v58 = vmul.f32 %v5227_v55, %v3360_v51  ;;  %v3361_v5 = vmul.f32 %v5223_v19, %v3357_v1  ;;  %v3292_v19 = vmul.f32 0.5, %v6059_v36  ;;  %v4380_v36 = vld [vmem:[%s935_s13] ss:$0 sm:$0xff] }
0x11f2   : > { %v3382_v59 = vsub.f32 1.0, %v3378_v56  ;;  %v3379_v3 = vmul.f32 %v5229_v61, %v3359_v60 }
0x11f3   : > { %v3384_v0 = vsub.f32 1.0, %v3380_v58  ;;  %v3381_v40 = vmul.f32 %v5231_v54, %v3361_v5 }
0x11f4   : > { %v3386_v38 = vmul.f32 %v3382_v59, %v3302_v63  ;;  %v3383_v7 = vsub.f32 1.0, %v3379_v3 }
0x11f5   : > { %v3388_v6 = vmul.f32 %v3384_v0, %v3304_v4  ;;  %v3385_v12 = vsub.f32 1.0, %v3381_v40 }
0x11f6   : > { %v3390_v8 = vadd.f32 1.0, %v3386_v38  ;;  %v3387_v10 = vmul.f32 %v3383_v7, %v3303_v9 }
0x11f7   : > { %v3392_v13 = vadd.f32 1.0, %v3388_v6  ;;  %v3389_v18 = vmul.f32 %v3385_v12, %v3305_v15 }
0x11f8   : > { %v3391_v46 = vadd.f32 1.0, %v3387_v10  ;;  %v3394_v17 = vmul.f32 %v3390_v8, %v3290_v11 }
0x11f9   : > { %v3393_v23 = vadd.f32 1.0, %v3389_v18  ;;  %v3396_v53 = vmul.f32 %v3392_v13, %v3292_v19 }
0x11fa   : > { %v3395_v21 = vmul.f32 %v3391_v46, %v3291_v14  ;;  %v3398_v24 = vpack.c.bf16 %v3394_v17, %v3394_v17 }
0x11fb   : > { %v3397_v25 = vmul.f32 %v3393_v23, %v3293_v22  ;;  %v3400_v26 = vpack.c.bf16 %v3396_v53, %v3396_v53 }
0x11fc   : > { %v3399_v45 = vpack.c.bf16 %v3395_v21, %v3395_v21 }
0x11fd   : > { %v3401_v35 = vpack.c.bf16 %v3397_v25, %v3397_v25 }
0x11fe   : > { %3697 = vmatprep.mubr.bf16.mxu1 %v3399_v45 }
0x11ff   : > { %3698 = vmatmul.mubr.bf16.vlgmr.msra.gmra.mxu1 %v3398_v24  ;;  %3737 = vmatprep.mubr.bf16.mxu0 %v3401_v35 }
0x1200   : > { %3738 = vmatmul.mubr.bf16.vlgmr.msra.gmra.mxu0 %v3400_v26 }
0x12bf   : > { %v4580_v41 = vpop.f32.mrf.mxu1 }
0x12c0   : > { %v4602_v20 = vpop.f32.mrf.mxu0 }
0x12c1   : > { %v4581_v27 = vpop.f32.mrf.mxu1 }
0x12c2   : > { %v4582_v28 = vadd.f32 %v4581_v27, %v4580_v41  ;;  %v4603_v31 = vpop.f32.mrf.mxu0 }
0x12c3   : > { %v4583_v29 = vpop.f32.mrf.mxu1  ;;  %v4604_v32 = vadd.f32 %v4603_v31, %v4602_v20 }
0x12c4   : > { %v3700_v30 = vadd.f32 %v4582_v28, %v4380_v36  ;;  %v4605_v34 = vpop.f32.mrf.mxu0 }
0x12c5   : > { %v4584_v33 = vpop.f32.mrf.mxu1 }
0x12c6   : > { %v3740_v37 = vadd.f32 %v4604_v32, %v3700_v30  ;;  %v4606_v39 = vpop.f32.mrf.mxu0  ;;  %3750 = sbr.rel (%p4413_p1) target bundleno = 5118 (0x13fe), region = 112 }
0x12c8   : > { %v3745_v50 = vadd.f32 %v3740_v37, %v5974_v2 }
0x12ca   : > { %3746 = vst [vmem:[%s5613_s9] sm:$0xff] %v3745_v50 }
0x12cb   : > { %3753 = vadd.xlane.f32.xlu0 %v3745_v50  ;;  %v4414_v2 = vld [vmem:[%s6257_s3] ss:$0 sm:$0xff] }
0x12cc   : > { %v4415_v56 = vld [vmem:[%s6258_s2] ss:$0 sm:$0xff] }
0x1354   : > { %v3754_v42 = vpop.xlane.xlu0 %3753 }
0x1355   : > { %v3755_v43 = vmul.f32 0.0078125, %v3754_v42 }
0x1357   : > { %v3756_v44 = vsub.f32 %v3745_v50, %v3755_v43 }
0x1359   : > { %v3757_v47 = vmul.f32 %v3756_v44, %v3756_v44 }
0x135b   : > { %3758 = vadd.xlane.f32.xlu0 %v3757_v47 }
0x13e4   : > { %v3759_v48 = vpop.xlane.xlu0 %3758 }
0x13e5   : > { %v3760_v49 = vmul.f32 0.0078125, %v3759_v48 }
0x13e7   : > { %v3761_v51 = vadd.f32 1e-06, %v3760_v49 }
0x13e9   : > { %5233 = vrsqrt.f32 %v3761_v51 }
0x13f6   : > { %v5234_v52 = vpop.eup %5233 }
0x13f7   : > { %v3763_v55 = vmul.f32 %v5234_v52, %v3756_v44 }
0x13f9   : > { %v3770_v57 = vmul.f32 %v4414_v2, %v3763_v55 }
0x13fb   : > { %v3777_v58 = vadd.f32 %v4415_v56, %v3770_v57 }
0x13fd   : > { %3778 = vst [vmem:[%s5613_s9] sm:$0xff] %v3777_v58 }
0x13fe PF: > { %s6259_s26 = sld [smem:[#allocation9_spill]]  ;;  %s3793_s6 = sshll.u32 %s5613_s9, 4  ;;  %s3794_s6 = int_to_ptr.vmem [resolvable:$true] %s3793_s6 }
0x13ff   : > { %s6260_s0 = sld [smem:[#allocation6_spill]]  ;;  %s5235_s5 = scalar_lea.vmem %s3794_s6, 128 }
0x1400   : > { %s6262_s20 = sld [smem:[#allocation38_spill]]  ;;  %p5236_p2 = scmp.ne.s32.totalorder %s3794_s6, %s5235_s5 }
0x1401   : > { %s5338_s7 = smov [#allocation2]  }
0x1402   : > { %p5237_p4 = pnand %p5236_p2, %p5498_p3  ;;  %s5239_s8 = sshll.u32 %s5338_s7, 4  ;;  %s5240_s8 = int_to_ptr.vmem [resolvable:$false] %s5239_s8 }
0x1403   : > { %s5241_s30 = scalar_lea.vmem %s5240_s8, 256  ;;  %p5242_p6 = scmp.lt.s32.totalorder %s3794_s6, %s5240_s8 }
0x1404   : > { %s4417_s24 = sshll.u32 %s6259_s26, 7  ;;  %p5238_p5 = pneg %p5237_p4 }
0x1405   : > { %s6263_s18 = sand.u32 1, %s6260_s0   ;;  %p5243_p7 = scmp.lt.s32.totalorder %s5241_s30, %s5235_s5 }
0x1406   : > { %s3791_s25 = scalar_lea.hbm %s6262_s20, %s4417_s24  ;;  %s3780_s22 = scalar_lea.sflag [#allocation3], %s6263_s18 }
0x1407   : > { %p5244_p8 = por %p5243_p7, %p5242_p6 }
0x1409   : > { %p5245_p10 = pnand %p5244_p8, %p5238_p5 }
0x140b   : > { %5248 = shalt.err (!%p5245_p10)
}
0x140c   : > { %s5249_s10 = scalar_lea.hbm %s3791_s25, 128  ;;  %s5253_s16 = scalar_lea.hbm %s6262_s20, 256 }
0x140d   : > { %p5250_p11 = scmp.ne.s32.totalorder %s3791_s25, %s5249_s10  ;;  %p5254_p0 = scmp.lt.s32.totalorder %s3791_s25, %s6262_s20 }
0x140e   : > { %p5255_p1 = scmp.lt.s32.totalorder %s5253_s16, %s5249_s10 }
0x140f   : > { %p5251_p12 = pnand %p5250_p11, %p5498_p3 }
0x1410   : > { %p5256_p2 = por %p5255_p1, %p5254_p0 }
0x1411   : > { %p5252_p13 = pneg %p5251_p12 }
0x1413   : > { %p5257_p4 = pnand %p5256_p2, %p5252_p13 }
0x1415   : > { %5260 = shalt.err (!%p5257_p4)
}
0x1416   : > { %4928 = dma.vmem_to_hbm [thread:$0]  (%p5498_p3), %s3794_s6, 128, %s3791_s25, %s3780_s22  }
0x1417 PF: > { %s6264_s13 = sld [smem:[#allocation12_spill]] }
0x1418   : > { %s6265_s1 = sld [smem:[#allocation5_spill]] }
0x141d   : > { %p4934_p5 = scmp.ge.s32.totalorder %s6264_s13, 2 }
0x141e   : > { %s3805_s19 = sand.u32 1, %s6265_s1  }
0x141f   : > { %p4931_p6 = pnand %p4934_p5, %p5508_p9  ;;  %s3806_s28 = scalar_lea.sflag [#allocation3], %s3805_s19 }
0x1421   : > { %p4932_p7 = pneg %p4931_p6 }
0x1423   : > { %5294 = dma.done.wait (%p4932_p7), %s3806_s28, 128  }
0x1424   : > { %5296 = vsyncadd (%p4932_p7), %s3806_s28, 4294967168  ;;  %s34_s0 = sadd.s32 1, %s6264_s13   ;;  %s6267_s2 = sld [smem:[#allocation6_spill]] }
0x1425   : > { %p31_p8 = scmp.ge.s32.totalorder %s34_s0, 6   ;;  %s6268_s25 = sld [smem:[#allocation7_spill]] }
0x1426   : > { %s6269_s26 = sld [smem:[#allocation17_spill]] }
0x1427   : > { %s6270_s27 = sld [smem:[#allocation10_spill]]  ;;  %33 = sbr.rel (!%p31_p8) target bundleno = 25 (0x19), region = 213 }
0x1428   : > { %s6271_s3 = sld [smem:[#allocation11_spill]] }
0x1429   : > { %s6272_s28 = sld [smem:[#allocation13_spill]] }
0x142a   : > { %s6273_s29 = sld [smem:[#allocation15_spill]] }
0x142c   :  { %3811 = vsyncpa [#allocation3], 1 }
0x142d   :  { %3813 = vsyncpa [#allocation3 + $0x1], 1 }

</bundles_post_ra>
